<compile_context>
chip_gen: v7x
topology: tpu7x:2x2x1
jax: 0.10.0
libtpu: 0.0.40
codegen_flags: <defaults>
</compile_context>

<pallas_src>
import functools

import jax
import jax.numpy as jnp
from jax.experimental import pallas as pl
from jax.experimental.pallas import tpu as pltpu

_LANE = 128


# -----------------------------------------------------------------------------
# Shared in-kernel math: conditional affine->sigmoid flow + BoxUniform log_prob.
# -----------------------------------------------------------------------------
def _cond_affine_sigmoid(x, ctx, w1_ref, b1_ref, w2ls_ref, w2sh_ref, b2_ref,
                         hidden):
    """Returns (z, log_prob) for a (tr, 128) lane-dense block."""
    # Conditioner MLP (H tanh units) unrolled on VPU/EUP; weights are SMEM
    # scalars.  Unit 0 seeds the accumulators with the output bias folded in --
    # no zeros_like broadcasts (JAX does not CSE broadcast_in_dim).
    h0 = jnp.tanh(ctx * w1_ref[0] + b1_ref[0])
    log_scale = h0 * w2ls_ref[0] + b2_ref[0]
    shift = h0 * w2sh_ref[0] + b2_ref[1]
    for j in range(1, hidden):
        h_j = jnp.tanh(ctx * w1_ref[j] + b1_ref[j])
        log_scale = log_scale + h_j * w2ls_ref[j]
        shift = shift + h_j * w2sh_ref[j]

    scale = jnp.exp(log_scale)

    # Affine + sigmoid transform and its log|det|:
    #   z   = sigmoid(y) = exp(y - softplus(y))
    #   lad = log_scale - softplus(y) - softplus(-y) = log_scale + y - 2*softplus(y)
    y = x * scale + shift
    sp = jax.nn.softplus(y)
    z = jnp.exp(y - sp)
    lad = log_scale + y - 2.0 * sp

    # Eval-mode reflection from transform_to_noise() is provably dead for this
    # instantiation: scale = exp(log_scale) > 0 implies
    # sigmoid(0.1*scale+shift) < sigmoid(0.8*scale+shift), so `lb > rb` never
    # holds; the probe transforms / compare / select are removed.

    # BoxUniform([0], [1]).log_prob(z) is 0 inside the unit box, -inf outside.
    in_box = jnp.logical_and(z >= 0.0, z <= 1.0)
    logp = jnp.where(in_box, lad, -jnp.inf)
    return z, logp


def _logprob_kernel(w1_ref, b1_ref, w2ls_ref, w2sh_ref, b2_ref,
                    x_ref, c_ref, z_ref, logp_ref, *, hidden):
    z, logp = _cond_affine_sigmoid(x_ref[...], c_ref[...], w1_ref, b1_ref,
                                   w2ls_ref, w2sh_ref, b2_ref, hidden)
    z_ref[...] = z
    logp_ref[...] = logp


def _loss_kernel(w1_ref, b1_ref, w2ls_ref, w2sh_ref, b2_ref,
                 x_ref, c_ref, keep_ref, psum_ref, *, hidden):
    _, logp = _cond_affine_sigmoid(x_ref[...], c_ref[...], w1_ref, b1_ref,
                                   w2ls_ref, w2sh_ref, b2_ref, hidden)
    keep = keep_ref[...]
    # keep == 0 for padded lanes and for labels != 0.  Use a select (not a
    # multiply) so a legitimate -inf logp under keep > 0 still propagates while
    # masked lanes can never produce 0 * -inf = NaN.
    contrib = jnp.where(keep > 0.0, logp, 0.0)
    # Fold the (tr, 128) block into an (8, 128) partial sum with aligned
    # sublane-tile slices + vreg adds (no cross-lane XLU work).
    rows = contrib.shape[0]
    psum = contrib[0:8, :]
    for r in range(1, rows // 8):
        psum = psum + contrib[r * 8:(r + 1) * 8, :]
    psum_ref[...] = psum


# -----------------------------------------------------------------------------
# Wrapper helpers: lane-dense layout + block geometry + flat SMEM weights.
# -----------------------------------------------------------------------------
def _block_rows(r8, max_block_rows):
    """Largest power-of-two row-block <= max_block_rows keeping padded rows
    <= 12.5% of the batch and (when possible) >= 2 grid blocks for v7x."""
    best = 8
    tr = 8
    while tr <= max_block_rows:
        nblocks = -(-r8 // tr)
        waste = nblocks * tr - r8
        if waste * 8 <= r8 and (nblocks >= 2 or r8 <= 8):
            best = tr
        tr *= 2
    return best


def _geometry(n, max_block_rows):
    r_raw = -(-n // _LANE)
    r8 = -(-r_raw // 8) * 8
    tr = _block_rows(r8, max_block_rows)
    nblocks = -(-r8 // tr)
    r_pad = nblocks * tr
    return tr, nblocks, r_pad, r_pad * _LANE


def _lane_dense(v, n_pad, fill):
    """Flatten to 1-D f32, pad to n_pad (fusable jnp.pad) and view as (R, 128)."""
    v = jnp.asarray(v, jnp.float32).reshape(-1)
    pad = n_pad - v.shape[0]
    if pad:
        v = jnp.pad(v, (0, pad), constant_values=fill)
    return v.reshape(-1, _LANE)


def _flat_weights(w1, b1, w2, b2):
    w1f = jnp.asarray(w1, jnp.float32).reshape(-1)     # (H,)
    b1f = jnp.asarray(b1, jnp.float32).reshape(-1)     # (H,)
    w2a = jnp.asarray(w2, jnp.float32)
    w2ls = w2a[:, 0]                                   # (H,) -> log_scale head
    w2sh = w2a[:, 1]                                   # (H,) -> shift head
    b2f = jnp.asarray(b2, jnp.float32).reshape(-1)     # (2,)
    return w1f, b1f, w2ls, w2sh, b2f, int(w1f.shape[0])


# -----------------------------------------------------------------------------
# log_prob(inputs, context) -> (z, log_prob), each of shape (N, 1).
# -----------------------------------------------------------------------------
def flow_decorrelator_log_prob(inputs, context, w1, b1, w2, b2,
                               *, center=0.5, max_block_rows=512):
    # `center` is kept for API parity with the module; the eval-mode reflection
    # that uses it is provably never taken for this flow (see kernel comment).
    del center
    n = inputs.shape[0]
    assert context.reshape(-1).shape[0] == n, "inputs/context batch mismatch"
    tr, nblocks, r_pad, n_pad = _geometry(n, max_block_rows)

    x2 = _lane_dense(inputs, n_pad, 0.5)
    c2 = _lane_dense(context, n_pad, 0.0)
    w1f, b1f, w2ls, w2sh, b2f, hidden = _flat_weights(w1, b1, w2, b2)

    row_spec = pl.BlockSpec((tr, _LANE), lambda i: (i, 0))
    smem_spec = pl.BlockSpec(memory_space=pltpu.MemorySpace.SMEM)

    z2, logp2 = pl.pallas_call(
        functools.partial(_logprob_kernel, hidden=hidden),
        out_shape=(jax.ShapeDtypeStruct((r_pad, _LANE), jnp.float32),
                   jax.ShapeDtypeStruct((r_pad, _LANE), jnp.float32)),
        grid_spec=pltpu.PrefetchScalarGridSpec(
            num_scalar_prefetch=0,
            grid=(nblocks,),
            in_specs=[smem_spec] * 5 + [row_spec, row_spec],
            out_specs=[row_spec, row_spec],
        ),
        compiler_params=pltpu.CompilerParams(
            dimension_semantics=("parallel",)),
    )(w1f, b1f, w2ls, w2sh, b2f, x2, c2)

    z = z2.reshape(-1)[:n].reshape(n, 1)
    logp = logp2.reshape(-1)[:n].reshape(n, 1)
    return z, logp


# -----------------------------------------------------------------------------
# compute_loss: -log_prob(encodings | mass)[labels == 0].mean(), fused in-kernel
# (no z / logp writeback; per-block (8,128) masked partial sums only).
# -----------------------------------------------------------------------------
def flow_decorrelator_compute_loss(encodings, labels, mass, w1, b1, w2, b2,
                                   *, center=0.5, max_block_rows=512):
    del center
    n = encodings.shape[0]
    tr, nblocks, r_pad, n_pad = _geometry(n, max_block_rows)

    keep = (labels.reshape(-1) == 0).astype(jnp.float32)   # 1.0 where label == 0
    x2 = _lane_dense(encodings, n_pad, 0.5)
    c2 = _lane_dense(mass, n_pad, 0.0)
    k2 = _lane_dense(keep, n_pad, 0.0)                      # padded lanes masked out
    w1f, b1f, w2ls, w2sh, b2f, hidden = _flat_weights(w1, b1, w2, b2)

    row_spec = pl.BlockSpec((tr, _LANE), lambda i: (i, 0))
    smem_spec = pl.BlockSpec(memory_space=pltpu.MemorySpace.SMEM)

    psum = pl.pallas_call(
        functools.partial(_loss_kernel, hidden=hidden),
        out_shape=jax.ShapeDtypeStruct((nblocks * 8, _LANE), jnp.float32),
        grid_spec=pltpu.PrefetchScalarGridSpec(
            num_scalar_prefetch=0,
            grid=(nblocks,),
            in_specs=[smem_spec] * 5 + [row_spec, row_spec, row_spec],
            out_specs=pl.BlockSpec((8, _LANE), lambda i: (i, 0)),
        ),
        compiler_params=pltpu.CompilerParams(
            dimension_semantics=("parallel",)),
    )(w1f, b1f, w2ls, w2sh, b2f, x2, c2, k2)

    count = jnp.maximum(jnp.sum(keep), 1.0)
    return -jnp.sum(psum) / count


# -----------------------------------------------------------------------------
# Pure-JAX reference (keeps the eval-mode reflection to prove it never fires).
# -----------------------------------------------------------------------------
def _reference(inputs, context, w1, b1, w2, b2, center=0.5):
    h = jnp.tanh(context @ w1 + b1)
    params = h @ w2 + b2
    log_scale, shift = params[:, 0:1], params[:, 1:2]
    scale = jnp.exp(log_scale)

    def transform(u):
        y = u * scale + shift
        return jax.nn.sigmoid(y), log_scale - jax.nn.softplus(y) - jax.nn.softplus(-y)

    z, lad = transform(inputs)
    lb, _ = transform(jnp.full_like(inputs, 0.1))
    rb, _ = transform(jnp.full_like(inputs, 0.8))
    z = jnp.where(lb > rb, -z + 2.0 * center, z)
    base_lp = jnp.where((z >= 0.0) & (z <= 1.0), 0.0, -jnp.inf)
    return z, lad + base_lp


if __name__ == "__main__":
    key = jax.random.PRNGKey(0)
    N, H = 1000, 32  # 1000 samples of a 1D discriminant (exercises padding), hidden width 32

    k_in, k_ctx, k_lbl, k_w1, k_b1, k_w2, k_b2 = jax.random.split(key, 7)

    # 1D discriminant in (0, 1), context = mass, labels in {0, 1}.
    inputs = jax.random.uniform(k_in, (N, 1), dtype=jnp.float32,
                                minval=0.05, maxval=0.95)
    mass = jax.random.uniform(k_ctx, (N,), dtype=jnp.float32,
                              minval=-1.0, maxval=1.0)
    labels = jax.random.randint(k_lbl, (N,), 0, 2)

    # Deterministic conditioner-MLP parameters (synthetic, not a checkpoint).
    w1 = 0.5 * jax.random.normal(k_w1, (1, H), dtype=jnp.float32)
    b1 = 0.1 * jax.random.normal(k_b1, (1, H), dtype=jnp.float32)
    w2 = 0.5 * jax.random.normal(k_w2, (H, 2), dtype=jnp.float32)
    b2 = 0.1 * jax.random.normal(k_b2, (1, 2), dtype=jnp.float32)

    z, logp = flow_decorrelator_log_prob(inputs, mass.reshape(-1, 1),
                                         w1, b1, w2, b2)
    loss = flow_decorrelator_compute_loss(inputs, labels, mass, w1, b1, w2, b2)
    jax.block_until_ready((z, logp, loss))

    z_ref, logp_ref = _reference(inputs, mass.reshape(-1, 1), w1, b1, w2, b2)
    mask = (labels == 0)
    cnt = jnp.maximum(jnp.sum(mask.astype(jnp.float32)), 1.0)
    loss_ref = -jnp.sum(jnp.where(mask, logp_ref[:, 0], 0.0)) / cnt

    assert jnp.allclose(z, z_ref, atol=2e-5, rtol=1e-5), "z mismatch"
    assert jnp.allclose(logp, logp_ref, atol=1e-4, rtol=1e-4), "logp mismatch"
    assert jnp.allclose(loss, loss_ref, atol=2e-4, rtol=2e-4), "loss mismatch"
    assert jnp.isfinite(loss), "loss not finite"

    # TODO(synk): forward() raises RuntimeError by design in PyTorch and
    # sample() needs the flow inverse + base-density RNG; the implemented path
    # is transform_to_noise -> log_prob -> compute_loss.
    print("KERNEL_OK")
</pallas_src>

<mosaic_0001>
module attributes {stable_mosaic.version = 11 : i64} {
  func.func @_logprob_kernel(%arg0: i32, %arg1: memref<32xf32, #tpu.memory_space<smem>>, %arg2: memref<32xf32, #tpu.memory_space<smem>>, %arg3: memref<32xf32, #tpu.memory_space<smem>>, %arg4: memref<32xf32, #tpu.memory_space<smem>>, %arg5: memref<2xf32, #tpu.memory_space<smem>>, %arg6: memref<8x128xf32, #tpu.memory_space<vmem>>, %arg7: memref<8x128xf32, #tpu.memory_space<vmem>>, %arg8: memref<8x128xf32, #tpu.memory_space<vmem>>, %arg9: memref<8x128xf32, #tpu.memory_space<vmem>>) attributes {dimension_semantics = [#tpu.dimension_semantics<parallel>], iteration_bounds = array<i64: 1>, scalar_prefetch = 0 : i64, scratch_operands = 0 : i64, tpu.core_type = #tpu.core_type<tc>, window_params = [{transform_indices = @transform_0, window_bounds = array<i64: 32>}, {transform_indices = @transform_1, window_bounds = array<i64: 32>}, {transform_indices = @transform_2, window_bounds = array<i64: 32>}, {transform_indices = @transform_3, window_bounds = array<i64: 32>}, {transform_indices = @transform_4, window_bounds = array<i64: 2>}, {transform_indices = @transform_5, window_bounds = array<i64: 8, 128>}, {transform_indices = @transform_6, window_bounds = array<i64: 8, 128>}, {transform_indices = @transform_7, window_bounds = array<i64: 8, 128>}, {transform_indices = @transform_8, window_bounds = array<i64: 8, 128>}]} {
    %c0 = arith.constant 0 : index
    %c0_0 = arith.constant 0 : index
    %0 = vector.load %arg6[%c0, %c0_0] : memref<8x128xf32, #tpu.memory_space<vmem>>, vector<8x128xf32>
    %c0_1 = arith.constant 0 : index
    %c0_2 = arith.constant 0 : index
    %1 = vector.load %arg7[%c0_1, %c0_2] : memref<8x128xf32, #tpu.memory_space<vmem>>, vector<8x128xf32>
    %c0_3 = arith.constant 0 : index
    %2 = memref.load %arg1[%c0_3] : memref<32xf32, #tpu.memory_space<smem>>
    %3 = vector.broadcast %2 : f32 to vector<8x128xf32>
    %4 = arith.mulf %1, %3 : vector<8x128xf32>
    %c0_4 = arith.constant 0 : index
    %5 = memref.load %arg2[%c0_4] : memref<32xf32, #tpu.memory_space<smem>>
    %6 = vector.broadcast %5 : f32 to vector<8x128xf32>
    %7 = arith.addf %4, %6 : vector<8x128xf32>
    %8 = math.tanh %7 : vector<8x128xf32>
    %c0_5 = arith.constant 0 : index
    %9 = memref.load %arg3[%c0_5] : memref<32xf32, #tpu.memory_space<smem>>
    %10 = vector.broadcast %9 : f32 to vector<8x128xf32>
    %11 = arith.mulf %8, %10 : vector<8x128xf32>
    %c0_6 = arith.constant 0 : index
    %12 = memref.load %arg5[%c0_6] : memref<2xf32, #tpu.memory_space<smem>>
    %13 = vector.broadcast %12 : f32 to vector<8x128xf32>
    %14 = arith.addf %11, %13 : vector<8x128xf32>
    %c0_7 = arith.constant 0 : index
    %15 = memref.load %arg4[%c0_7] : memref<32xf32, #tpu.memory_space<smem>>
    %16 = vector.broadcast %15 : f32 to vector<8x128xf32>
    %17 = arith.mulf %8, %16 : vector<8x128xf32>
    %c1 = arith.constant 1 : index
    %18 = memref.load %arg5[%c1] : memref<2xf32, #tpu.memory_space<smem>>
    %19 = vector.broadcast %18 : f32 to vector<8x128xf32>
    %20 = arith.addf %17, %19 : vector<8x128xf32>
    %c1_8 = arith.constant 1 : index
    %21 = memref.load %arg1[%c1_8] : memref<32xf32, #tpu.memory_space<smem>>
    %22 = vector.broadcast %21 : f32 to vector<8x128xf32>
    %23 = arith.mulf %1, %22 : vector<8x128xf32>
    %c1_9 = arith.constant 1 : index
    %24 = memref.load %arg2[%c1_9] : memref<32xf32, #tpu.memory_space<smem>>
    %25 = vector.broadcast %24 : f32 to vector<8x128xf32>
    %26 = arith.addf %23, %25 : vector<8x128xf32>
    %27 = math.tanh %26 : vector<8x128xf32>
    %c1_10 = arith.constant 1 : index
    %28 = memref.load %arg3[%c1_10] : memref<32xf32, #tpu.memory_space<smem>>
    %29 = vector.broadcast %28 : f32 to vector<8x128xf32>
    %30 = arith.mulf %27, %29 : vector<8x128xf32>
    %31 = arith.addf %14, %30 : vector<8x128xf32>
    %c1_11 = arith.constant 1 : index
    %32 = memref.load %arg4[%c1_11] : memref<32xf32, #tpu.memory_space<smem>>
    %33 = vector.broadcast %32 : f32 to vector<8x128xf32>
    %34 = arith.mulf %27, %33 : vector<8x128xf32>
    %35 = arith.addf %20, %34 : vector<8x128xf32>
    %c2 = arith.constant 2 : index
    %36 = memref.load %arg1[%c2] : memref<32xf32, #tpu.memory_space<smem>>
    %37 = vector.broadcast %36 : f32 to vector<8x128xf32>
    %38 = arith.mulf %1, %37 : vector<8x128xf32>
    %c2_12 = arith.constant 2 : index
    %39 = memref.load %arg2[%c2_12] : memref<32xf32, #tpu.memory_space<smem>>
    %40 = vector.broadcast %39 : f32 to vector<8x128xf32>
    %41 = arith.addf %38, %40 : vector<8x128xf32>
    %42 = math.tanh %41 : vector<8x128xf32>
    %c2_13 = arith.constant 2 : index
    %43 = memref.load %arg3[%c2_13] : memref<32xf32, #tpu.memory_space<smem>>
    %44 = vector.broadcast %43 : f32 to vector<8x128xf32>
    %45 = arith.mulf %42, %44 : vector<8x128xf32>
    %46 = arith.addf %31, %45 : vector<8x128xf32>
    %c2_14 = arith.constant 2 : index
    %47 = memref.load %arg4[%c2_14] : memref<32xf32, #tpu.memory_space<smem>>
    %48 = vector.broadcast %47 : f32 to vector<8x128xf32>
    %49 = arith.mulf %42, %48 : vector<8x128xf32>
    %50 = arith.addf %35, %49 : vector<8x128xf32>
    %c3 = arith.constant 3 : index
    %51 = memref.load %arg1[%c3] : memref<32xf32, #tpu.memory_space<smem>>
    %52 = vector.broadcast %51 : f32 to vector<8x128xf32>
    %53 = arith.mulf %1, %52 : vector<8x128xf32>
    %c3_15 = arith.constant 3 : index
    %54 = memref.load %arg2[%c3_15] : memref<32xf32, #tpu.memory_space<smem>>
    %55 = vector.broadcast %54 : f32 to vector<8x128xf32>
    %56 = arith.addf %53, %55 : vector<8x128xf32>
    %57 = math.tanh %56 : vector<8x128xf32>
    %c3_16 = arith.constant 3 : index
    %58 = memref.load %arg3[%c3_16] : memref<32xf32, #tpu.memory_space<smem>>
    %59 = vector.broadcast %58 : f32 to vector<8x128xf32>
    %60 = arith.mulf %57, %59 : vector<8x128xf32>
    %61 = arith.addf %46, %60 : vector<8x128xf32>
    %c3_17 = arith.constant 3 : index
    %62 = memref.load %arg4[%c3_17] : memref<32xf32, #tpu.memory_space<smem>>
    %63 = vector.broadcast %62 : f32 to vector<8x128xf32>
    %64 = arith.mulf %57, %63 : vector<8x128xf32>
    %65 = arith.addf %50, %64 : vector<8x128xf32>
    %c4 = arith.constant 4 : index
    %66 = memref.load %arg1[%c4] : memref<32xf32, #tpu.memory_space<smem>>
    %67 = vector.broadcast %66 : f32 to vector<8x128xf32>
    %68 = arith.mulf %1, %67 : vector<8x128xf32>
    %c4_18 = arith.constant 4 : index
    %69 = memref.load %arg2[%c4_18] : memref<32xf32, #tpu.memory_space<smem>>
    %70 = vector.broadcast %69 : f32 to vector<8x128xf32>
    %71 = arith.addf %68, %70 : vector<8x128xf32>
    %72 = math.tanh %71 : vector<8x128xf32>
    %c4_19 = arith.constant 4 : index
    %73 = memref.load %arg3[%c4_19] : memref<32xf32, #tpu.memory_space<smem>>
    %74 = vector.broadcast %73 : f32 to vector<8x128xf32>
    %75 = arith.mulf %72, %74 : vector<8x128xf32>
    %76 = arith.addf %61, %75 : vector<8x128xf32>
    %c4_20 = arith.constant 4 : index
    %77 = memref.load %arg4[%c4_20] : memref<32xf32, #tpu.memory_space<smem>>
    %78 = vector.broadcast %77 : f32 to vector<8x128xf32>
    %79 = arith.mulf %72, %78 : vector<8x128xf32>
    %80 = arith.addf %65, %79 : vector<8x128xf32>
    %c5 = arith.constant 5 : index
    %81 = memref.load %arg1[%c5] : memref<32xf32, #tpu.memory_space<smem>>
    %82 = vector.broadcast %81 : f32 to vector<8x128xf32>
    %83 = arith.mulf %1, %82 : vector<8x128xf32>
    %c5_21 = arith.constant 5 : index
    %84 = memref.load %arg2[%c5_21] : memref<32xf32, #tpu.memory_space<smem>>
    %85 = vector.broadcast %84 : f32 to vector<8x128xf32>
    %86 = arith.addf %83, %85 : vector<8x128xf32>
    %87 = math.tanh %86 : vector<8x128xf32>
    %c5_22 = arith.constant 5 : index
    %88 = memref.load %arg3[%c5_22] : memref<32xf32, #tpu.memory_space<smem>>
    %89 = vector.broadcast %88 : f32 to vector<8x128xf32>
    %90 = arith.mulf %87, %89 : vector<8x128xf32>
    %91 = arith.addf %76, %90 : vector<8x128xf32>
    %c5_23 = arith.constant 5 : index
    %92 = memref.load %arg4[%c5_23] : memref<32xf32, #tpu.memory_space<smem>>
    %93 = vector.broadcast %92 : f32 to vector<8x128xf32>
    %94 = arith.mulf %87, %93 : vector<8x128xf32>
    %95 = arith.addf %80, %94 : vector<8x128xf32>
    %c6 = arith.constant 6 : index
    %96 = memref.load %arg1[%c6] : memref<32xf32, #tpu.memory_space<smem>>
    %97 = vector.broadcast %96 : f32 to vector<8x128xf32>
    %98 = arith.mulf %1, %97 : vector<8x128xf32>
    %c6_24 = arith.constant 6 : index
    %99 = memref.load %arg2[%c6_24] : memref<32xf32, #tpu.memory_space<smem>>
    %100 = vector.broadcast %99 : f32 to vector<8x128xf32>
    %101 = arith.addf %98, %100 : vector<8x128xf32>
    %102 = math.tanh %101 : vector<8x128xf32>
    %c6_25 = arith.constant 6 : index
    %103 = memref.load %arg3[%c6_25] : memref<32xf32, #tpu.memory_space<smem>>
    %104 = vector.broadcast %103 : f32 to vector<8x128xf32>
    %105 = arith.mulf %102, %104 : vector<8x128xf32>
    %106 = arith.addf %91, %105 : vector<8x128xf32>
    %c6_26 = arith.constant 6 : index
    %107 = memref.load %arg4[%c6_26] : memref<32xf32, #tpu.memory_space<smem>>
    %108 = vector.broadcast %107 : f32 to vector<8x128xf32>
    %109 = arith.mulf %102, %108 : vector<8x128xf32>
    %110 = arith.addf %95, %109 : vector<8x128xf32>
    %c7 = arith.constant 7 : index
    %111 = memref.load %arg1[%c7] : memref<32xf32, #tpu.memory_space<smem>>
    %112 = vector.broadcast %111 : f32 to vector<8x128xf32>
    %113 = arith.mulf %1, %112 : vector<8x128xf32>
    %c7_27 = arith.constant 7 : index
    %114 = memref.load %arg2[%c7_27] : memref<32xf32, #tpu.memory_space<smem>>
    %115 = vector.broadcast %114 : f32 to vector<8x128xf32>
    %116 = arith.addf %113, %115 : vector<8x128xf32>
    %117 = math.tanh %116 : vector<8x128xf32>
    %c7_28 = arith.constant 7 : index
    %118 = memref.load %arg3[%c7_28] : memref<32xf32, #tpu.memory_space<smem>>
    %119 = vector.broadcast %118 : f32 to vector<8x128xf32>
    %120 = arith.mulf %117, %119 : vector<8x128xf32>
    %121 = arith.addf %106, %120 : vector<8x128xf32>
    %c7_29 = arith.constant 7 : index
    %122 = memref.load %arg4[%c7_29] : memref<32xf32, #tpu.memory_space<smem>>
    %123 = vector.broadcast %122 : f32 to vector<8x128xf32>
    %124 = arith.mulf %117, %123 : vector<8x128xf32>
    %125 = arith.addf %110, %124 : vector<8x128xf32>
    %c8 = arith.constant 8 : index
    %126 = memref.load %arg1[%c8] : memref<32xf32, #tpu.memory_space<smem>>
    %127 = vector.broadcast %126 : f32 to vector<8x128xf32>
    %128 = arith.mulf %1, %127 : vector<8x128xf32>
    %c8_30 = arith.constant 8 : index
    %129 = memref.load %arg2[%c8_30] : memref<32xf32, #tpu.memory_space<smem>>
    %130 = vector.broadcast %129 : f32 to vector<8x128xf32>
    %131 = arith.addf %128, %130 : vector<8x128xf32>
    %132 = math.tanh %131 : vector<8x128xf32>
    %c8_31 = arith.constant 8 : index
    %133 = memref.load %arg3[%c8_31] : memref<32xf32, #tpu.memory_space<smem>>
    %134 = vector.broadcast %133 : f32 to vector<8x128xf32>
    %135 = arith.mulf %132, %134 : vector<8x128xf32>
    %136 = arith.addf %121, %135 : vector<8x128xf32>
    %c8_32 = arith.constant 8 : index
    %137 = memref.load %arg4[%c8_32] : memref<32xf32, #tpu.memory_space<smem>>
    %138 = vector.broadcast %137 : f32 to vector<8x128xf32>
    %139 = arith.mulf %132, %138 : vector<8x128xf32>
    %140 = arith.addf %125, %139 : vector<8x128xf32>
    %c9 = arith.constant 9 : index
    %141 = memref.load %arg1[%c9] : memref<32xf32, #tpu.memory_space<smem>>
    %142 = vector.broadcast %141 : f32 to vector<8x128xf32>
    %143 = arith.mulf %1, %142 : vector<8x128xf32>
    %c9_33 = arith.constant 9 : index
    %144 = memref.load %arg2[%c9_33] : memref<32xf32, #tpu.memory_space<smem>>
    %145 = vector.broadcast %144 : f32 to vector<8x128xf32>
    %146 = arith.addf %143, %145 : vector<8x128xf32>
    %147 = math.tanh %146 : vector<8x128xf32>
    %c9_34 = arith.constant 9 : index
    %148 = memref.load %arg3[%c9_34] : memref<32xf32, #tpu.memory_space<smem>>
    %149 = vector.broadcast %148 : f32 to vector<8x128xf32>
    %150 = arith.mulf %147, %149 : vector<8x128xf32>
    %151 = arith.addf %136, %150 : vector<8x128xf32>
    %c9_35 = arith.constant 9 : index
    %152 = memref.load %arg4[%c9_35] : memref<32xf32, #tpu.memory_space<smem>>
    %153 = vector.broadcast %152 : f32 to vector<8x128xf32>
    %154 = arith.mulf %147, %153 : vector<8x128xf32>
    %155 = arith.addf %140, %154 : vector<8x128xf32>
    %c10 = arith.constant 10 : index
    %156 = memref.load %arg1[%c10] : memref<32xf32, #tpu.memory_space<smem>>
    %157 = vector.broadcast %156 : f32 to vector<8x128xf32>
    %158 = arith.mulf %1, %157 : vector<8x128xf32>
    %c10_36 = arith.constant 10 : index
    %159 = memref.load %arg2[%c10_36] : memref<32xf32, #tpu.memory_space<smem>>
    %160 = vector.broadcast %159 : f32 to vector<8x128xf32>
    %161 = arith.addf %158, %160 : vector<8x128xf32>
    %162 = math.tanh %161 : vector<8x128xf32>
    %c10_37 = arith.constant 10 : index
    %163 = memref.load %arg3[%c10_37] : memref<32xf32, #tpu.memory_space<smem>>
    %164 = vector.broadcast %163 : f32 to vector<8x128xf32>
    %165 = arith.mulf %162, %164 : vector<8x128xf32>
    %166 = arith.addf %151, %165 : vector<8x128xf32>
    %c10_38 = arith.constant 10 : index
    %167 = memref.load %arg4[%c10_38] : memref<32xf32, #tpu.memory_space<smem>>
    %168 = vector.broadcast %167 : f32 to vector<8x128xf32>
    %169 = arith.mulf %162, %168 : vector<8x128xf32>
    %170 = arith.addf %155, %169 : vector<8x128xf32>
    %c11 = arith.constant 11 : index
    %171 = memref.load %arg1[%c11] : memref<32xf32, #tpu.memory_space<smem>>
    %172 = vector.broadcast %171 : f32 to vector<8x128xf32>
    %173 = arith.mulf %1, %172 : vector<8x128xf32>
    %c11_39 = arith.constant 11 : index
    %174 = memref.load %arg2[%c11_39] : memref<32xf32, #tpu.memory_space<smem>>
    %175 = vector.broadcast %174 : f32 to vector<8x128xf32>
    %176 = arith.addf %173, %175 : vector<8x128xf32>
    %177 = math.tanh %176 : vector<8x128xf32>
    %c11_40 = arith.constant 11 : index
    %178 = memref.load %arg3[%c11_40] : memref<32xf32, #tpu.memory_space<smem>>
    %179 = vector.broadcast %178 : f32 to vector<8x128xf32>
    %180 = arith.mulf %177, %179 : vector<8x128xf32>
    %181 = arith.addf %166, %180 : vector<8x128xf32>
    %c11_41 = arith.constant 11 : index
    %182 = memref.load %arg4[%c11_41] : memref<32xf32, #tpu.memory_space<smem>>
    %183 = vector.broadcast %182 : f32 to vector<8x128xf32>
    %184 = arith.mulf %177, %183 : vector<8x128xf32>
    %185 = arith.addf %170, %184 : vector<8x128xf32>
    %c12 = arith.constant 12 : index
    %186 = memref.load %arg1[%c12] : memref<32xf32, #tpu.memory_space<smem>>
    %187 = vector.broadcast %186 : f32 to vector<8x128xf32>
    %188 = arith.mulf %1, %187 : vector<8x128xf32>
    %c12_42 = arith.constant 12 : index
    %189 = memref.load %arg2[%c12_42] : memref<32xf32, #tpu.memory_space<smem>>
    %190 = vector.broadcast %189 : f32 to vector<8x128xf32>
    %191 = arith.addf %188, %190 : vector<8x128xf32>
    %192 = math.tanh %191 : vector<8x128xf32>
    %c12_43 = arith.constant 12 : index
    %193 = memref.load %arg3[%c12_43] : memref<32xf32, #tpu.memory_space<smem>>
    %194 = vector.broadcast %193 : f32 to vector<8x128xf32>
    %195 = arith.mulf %192, %194 : vector<8x128xf32>
    %196 = arith.addf %181, %195 : vector<8x128xf32>
    %c12_44 = arith.constant 12 : index
    %197 = memref.load %arg4[%c12_44] : memref<32xf32, #tpu.memory_space<smem>>
    %198 = vector.broadcast %197 : f32 to vector<8x128xf32>
    %199 = arith.mulf %192, %198 : vector<8x128xf32>
    %200 = arith.addf %185, %199 : vector<8x128xf32>
    %c13 = arith.constant 13 : index
    %201 = memref.load %arg1[%c13] : memref<32xf32, #tpu.memory_space<smem>>
    %202 = vector.broadcast %201 : f32 to vector<8x128xf32>
    %203 = arith.mulf %1, %202 : vector<8x128xf32>
    %c13_45 = arith.constant 13 : index
    %204 = memref.load %arg2[%c13_45] : memref<32xf32, #tpu.memory_space<smem>>
    %205 = vector.broadcast %204 : f32 to vector<8x128xf32>
    %206 = arith.addf %203, %205 : vector<8x128xf32>
    %207 = math.tanh %206 : vector<8x128xf32>
    %c13_46 = arith.constant 13 : index
    %208 = memref.load %arg3[%c13_46] : memref<32xf32, #tpu.memory_space<smem>>
    %209 = vector.broadcast %208 : f32 to vector<8x128xf32>
    %210 = arith.mulf %207, %209 : vector<8x128xf32>
    %211 = arith.addf %196, %210 : vector<8x128xf32>
    %c13_47 = arith.constant 13 : index
    %212 = memref.load %arg4[%c13_47] : memref<32xf32, #tpu.memory_space<smem>>
    %213 = vector.broadcast %212 : f32 to vector<8x128xf32>
    %214 = arith.mulf %207, %213 : vector<8x128xf32>
    %215 = arith.addf %200, %214 : vector<8x128xf32>
    %c14 = arith.constant 14 : index
    %216 = memref.load %arg1[%c14] : memref<32xf32, #tpu.memory_space<smem>>
    %217 = vector.broadcast %216 : f32 to vector<8x128xf32>
    %218 = arith.mulf %1, %217 : vector<8x128xf32>
    %c14_48 = arith.constant 14 : index
    %219 = memref.load %arg2[%c14_48] : memref<32xf32, #tpu.memory_space<smem>>
    %220 = vector.broadcast %219 : f32 to vector<8x128xf32>
    %221 = arith.addf %218, %220 : vector<8x128xf32>
    %222 = math.tanh %221 : vector<8x128xf32>
    %c14_49 = arith.constant 14 : index
    %223 = memref.load %arg3[%c14_49] : memref<32xf32, #tpu.memory_space<smem>>
    %224 = vector.broadcast %223 : f32 to vector<8x128xf32>
    %225 = arith.mulf %222, %224 : vector<8x128xf32>
    %226 = arith.addf %211, %225 : vector<8x128xf32>
    %c14_50 = arith.constant 14 : index
    %227 = memref.load %arg4[%c14_50] : memref<32xf32, #tpu.memory_space<smem>>
    %228 = vector.broadcast %227 : f32 to vector<8x128xf32>
    %229 = arith.mulf %222, %228 : vector<8x128xf32>
    %230 = arith.addf %215, %229 : vector<8x128xf32>
    %c15 = arith.constant 15 : index
    %231 = memref.load %arg1[%c15] : memref<32xf32, #tpu.memory_space<smem>>
    %232 = vector.broadcast %231 : f32 to vector<8x128xf32>
    %233 = arith.mulf %1, %232 : vector<8x128xf32>
    %c15_51 = arith.constant 15 : index
    %234 = memref.load %arg2[%c15_51] : memref<32xf32, #tpu.memory_space<smem>>
    %235 = vector.broadcast %234 : f32 to vector<8x128xf32>
    %236 = arith.addf %233, %235 : vector<8x128xf32>
    %237 = math.tanh %236 : vector<8x128xf32>
    %c15_52 = arith.constant 15 : index
    %238 = memref.load %arg3[%c15_52] : memref<32xf32, #tpu.memory_space<smem>>
    %239 = vector.broadcast %238 : f32 to vector<8x128xf32>
    %240 = arith.mulf %237, %239 : vector<8x128xf32>
    %241 = arith.addf %226, %240 : vector<8x128xf32>
    %c15_53 = arith.constant 15 : index
    %242 = memref.load %arg4[%c15_53] : memref<32xf32, #tpu.memory_space<smem>>
    %243 = vector.broadcast %242 : f32 to vector<8x128xf32>
    %244 = arith.mulf %237, %243 : vector<8x128xf32>
    %245 = arith.addf %230, %244 : vector<8x128xf32>
    %c16 = arith.constant 16 : index
    %246 = memref.load %arg1[%c16] : memref<32xf32, #tpu.memory_space<smem>>
    %247 = vector.broadcast %246 : f32 to vector<8x128xf32>
    %248 = arith.mulf %1, %247 : vector<8x128xf32>
    %c16_54 = arith.constant 16 : index
    %249 = memref.load %arg2[%c16_54] : memref<32xf32, #tpu.memory_space<smem>>
    %250 = vector.broadcast %249 : f32 to vector<8x128xf32>
    %251 = arith.addf %248, %250 : vector<8x128xf32>
    %252 = math.tanh %251 : vector<8x128xf32>
    %c16_55 = arith.constant 16 : index
    %253 = memref.load %arg3[%c16_55] : memref<32xf32, #tpu.memory_space<smem>>
    %254 = vector.broadcast %253 : f32 to vector<8x128xf32>
    %255 = arith.mulf %252, %254 : vector<8x128xf32>
    %256 = arith.addf %241, %255 : vector<8x128xf32>
    %c16_56 = arith.constant 16 : index
    %257 = memref.load %arg4[%c16_56] : memref<32xf32, #tpu.memory_space<smem>>
    %258 = vector.broadcast %257 : f32 to vector<8x128xf32>
    %259 = arith.mulf %252, %258 : vector<8x128xf32>
    %260 = arith.addf %245, %259 : vector<8x128xf32>
    %c17 = arith.constant 17 : index
    %261 = memref.load %arg1[%c17] : memref<32xf32, #tpu.memory_space<smem>>
    %262 = vector.broadcast %261 : f32 to vector<8x128xf32>
    %263 = arith.mulf %1, %262 : vector<8x128xf32>
    %c17_57 = arith.constant 17 : index
    %264 = memref.load %arg2[%c17_57] : memref<32xf32, #tpu.memory_space<smem>>
    %265 = vector.broadcast %264 : f32 to vector<8x128xf32>
    %266 = arith.addf %263, %265 : vector<8x128xf32>
    %267 = math.tanh %266 : vector<8x128xf32>
    %c17_58 = arith.constant 17 : index
    %268 = memref.load %arg3[%c17_58] : memref<32xf32, #tpu.memory_space<smem>>
    %269 = vector.broadcast %268 : f32 to vector<8x128xf32>
    %270 = arith.mulf %267, %269 : vector<8x128xf32>
    %271 = arith.addf %256, %270 : vector<8x128xf32>
    %c17_59 = arith.constant 17 : index
    %272 = memref.load %arg4[%c17_59] : memref<32xf32, #tpu.memory_space<smem>>
    %273 = vector.broadcast %272 : f32 to vector<8x128xf32>
    %274 = arith.mulf %267, %273 : vector<8x128xf32>
    %275 = arith.addf %260, %274 : vector<8x128xf32>
    %c18 = arith.constant 18 : index
    %276 = memref.load %arg1[%c18] : memref<32xf32, #tpu.memory_space<smem>>
    %277 = vector.broadcast %276 : f32 to vector<8x128xf32>
    %278 = arith.mulf %1, %277 : vector<8x128xf32>
    %c18_60 = arith.constant 18 : index
    %279 = memref.load %arg2[%c18_60] : memref<32xf32, #tpu.memory_space<smem>>
    %280 = vector.broadcast %279 : f32 to vector<8x128xf32>
    %281 = arith.addf %278, %280 : vector<8x128xf32>
    %282 = math.tanh %281 : vector<8x128xf32>
    %c18_61 = arith.constant 18 : index
    %283 = memref.load %arg3[%c18_61] : memref<32xf32, #tpu.memory_space<smem>>
    %284 = vector.broadcast %283 : f32 to vector<8x128xf32>
    %285 = arith.mulf %282, %284 : vector<8x128xf32>
    %286 = arith.addf %271, %285 : vector<8x128xf32>
    %c18_62 = arith.constant 18 : index
    %287 = memref.load %arg4[%c18_62] : memref<32xf32, #tpu.memory_space<smem>>
    %288 = vector.broadcast %287 : f32 to vector<8x128xf32>
    %289 = arith.mulf %282, %288 : vector<8x128xf32>
    %290 = arith.addf %275, %289 : vector<8x128xf32>
    %c19 = arith.constant 19 : index
    %291 = memref.load %arg1[%c19] : memref<32xf32, #tpu.memory_space<smem>>
    %292 = vector.broadcast %291 : f32 to vector<8x128xf32>
    %293 = arith.mulf %1, %292 : vector<8x128xf32>
    %c19_63 = arith.constant 19 : index
    %294 = memref.load %arg2[%c19_63] : memref<32xf32, #tpu.memory_space<smem>>
    %295 = vector.broadcast %294 : f32 to vector<8x128xf32>
    %296 = arith.addf %293, %295 : vector<8x128xf32>
    %297 = math.tanh %296 : vector<8x128xf32>
    %c19_64 = arith.constant 19 : index
    %298 = memref.load %arg3[%c19_64] : memref<32xf32, #tpu.memory_space<smem>>
    %299 = vector.broadcast %298 : f32 to vector<8x128xf32>
    %300 = arith.mulf %297, %299 : vector<8x128xf32>
    %301 = arith.addf %286, %300 : vector<8x128xf32>
    %c19_65 = arith.constant 19 : index
    %302 = memref.load %arg4[%c19_65] : memref<32xf32, #tpu.memory_space<smem>>
    %303 = vector.broadcast %302 : f32 to vector<8x128xf32>
    %304 = arith.mulf %297, %303 : vector<8x128xf32>
    %305 = arith.addf %290, %304 : vector<8x128xf32>
    %c20 = arith.constant 20 : index
    %306 = memref.load %arg1[%c20] : memref<32xf32, #tpu.memory_space<smem>>
    %307 = vector.broadcast %306 : f32 to vector<8x128xf32>
    %308 = arith.mulf %1, %307 : vector<8x128xf32>
    %c20_66 = arith.constant 20 : index
    %309 = memref.load %arg2[%c20_66] : memref<32xf32, #tpu.memory_space<smem>>
    %310 = vector.broadcast %309 : f32 to vector<8x128xf32>
    %311 = arith.addf %308, %310 : vector<8x128xf32>
    %312 = math.tanh %311 : vector<8x128xf32>
    %c20_67 = arith.constant 20 : index
    %313 = memref.load %arg3[%c20_67] : memref<32xf32, #tpu.memory_space<smem>>
    %314 = vector.broadcast %313 : f32 to vector<8x128xf32>
    %315 = arith.mulf %312, %314 : vector<8x128xf32>
    %316 = arith.addf %301, %315 : vector<8x128xf32>
    %c20_68 = arith.constant 20 : index
    %317 = memref.load %arg4[%c20_68] : memref<32xf32, #tpu.memory_space<smem>>
    %318 = vector.broadcast %317 : f32 to vector<8x128xf32>
    %319 = arith.mulf %312, %318 : vector<8x128xf32>
    %320 = arith.addf %305, %319 : vector<8x128xf32>
    %c21 = arith.constant 21 : index
    %321 = memref.load %arg1[%c21] : memref<32xf32, #tpu.memory_space<smem>>
    %322 = vector.broadcast %321 : f32 to vector<8x128xf32>
    %323 = arith.mulf %1, %322 : vector<8x128xf32>
    %c21_69 = arith.constant 21 : index
    %324 = memref.load %arg2[%c21_69] : memref<32xf32, #tpu.memory_space<smem>>
    %325 = vector.broadcast %324 : f32 to vector<8x128xf32>
    %326 = arith.addf %323, %325 : vector<8x128xf32>
    %327 = math.tanh %326 : vector<8x128xf32>
    %c21_70 = arith.constant 21 : index
    %328 = memref.load %arg3[%c21_70] : memref<32xf32, #tpu.memory_space<smem>>
    %329 = vector.broadcast %328 : f32 to vector<8x128xf32>
    %330 = arith.mulf %327, %329 : vector<8x128xf32>
    %331 = arith.addf %316, %330 : vector<8x128xf32>
    %c21_71 = arith.constant 21 : index
    %332 = memref.load %arg4[%c21_71] : memref<32xf32, #tpu.memory_space<smem>>
    %333 = vector.broadcast %332 : f32 to vector<8x128xf32>
    %334 = arith.mulf %327, %333 : vector<8x128xf32>
    %335 = arith.addf %320, %334 : vector<8x128xf32>
    %c22 = arith.constant 22 : index
    %336 = memref.load %arg1[%c22] : memref<32xf32, #tpu.memory_space<smem>>
    %337 = vector.broadcast %336 : f32 to vector<8x128xf32>
    %338 = arith.mulf %1, %337 : vector<8x128xf32>
    %c22_72 = arith.constant 22 : index
    %339 = memref.load %arg2[%c22_72] : memref<32xf32, #tpu.memory_space<smem>>
    %340 = vector.broadcast %339 : f32 to vector<8x128xf32>
    %341 = arith.addf %338, %340 : vector<8x128xf32>
    %342 = math.tanh %341 : vector<8x128xf32>
    %c22_73 = arith.constant 22 : index
    %343 = memref.load %arg3[%c22_73] : memref<32xf32, #tpu.memory_space<smem>>
    %344 = vector.broadcast %343 : f32 to vector<8x128xf32>
    %345 = arith.mulf %342, %344 : vector<8x128xf32>
    %346 = arith.addf %331, %345 : vector<8x128xf32>
    %c22_74 = arith.constant 22 : index
    %347 = memref.load %arg4[%c22_74] : memref<32xf32, #tpu.memory_space<smem>>
    %348 = vector.broadcast %347 : f32 to vector<8x128xf32>
    %349 = arith.mulf %342, %348 : vector<8x128xf32>
    %350 = arith.addf %335, %349 : vector<8x128xf32>
    %c23 = arith.constant 23 : index
    %351 = memref.load %arg1[%c23] : memref<32xf32, #tpu.memory_space<smem>>
    %352 = vector.broadcast %351 : f32 to vector<8x128xf32>
    %353 = arith.mulf %1, %352 : vector<8x128xf32>
    %c23_75 = arith.constant 23 : index
    %354 = memref.load %arg2[%c23_75] : memref<32xf32, #tpu.memory_space<smem>>
    %355 = vector.broadcast %354 : f32 to vector<8x128xf32>
    %356 = arith.addf %353, %355 : vector<8x128xf32>
    %357 = math.tanh %356 : vector<8x128xf32>
    %c23_76 = arith.constant 23 : index
    %358 = memref.load %arg3[%c23_76] : memref<32xf32, #tpu.memory_space<smem>>
    %359 = vector.broadcast %358 : f32 to vector<8x128xf32>
    %360 = arith.mulf %357, %359 : vector<8x128xf32>
    %361 = arith.addf %346, %360 : vector<8x128xf32>
    %c23_77 = arith.constant 23 : index
    %362 = memref.load %arg4[%c23_77] : memref<32xf32, #tpu.memory_space<smem>>
    %363 = vector.broadcast %362 : f32 to vector<8x128xf32>
    %364 = arith.mulf %357, %363 : vector<8x128xf32>
    %365 = arith.addf %350, %364 : vector<8x128xf32>
    %c24 = arith.constant 24 : index
    %366 = memref.load %arg1[%c24] : memref<32xf32, #tpu.memory_space<smem>>
    %367 = vector.broadcast %366 : f32 to vector<8x128xf32>
    %368 = arith.mulf %1, %367 : vector<8x128xf32>
    %c24_78 = arith.constant 24 : index
    %369 = memref.load %arg2[%c24_78] : memref<32xf32, #tpu.memory_space<smem>>
    %370 = vector.broadcast %369 : f32 to vector<8x128xf32>
    %371 = arith.addf %368, %370 : vector<8x128xf32>
    %372 = math.tanh %371 : vector<8x128xf32>
    %c24_79 = arith.constant 24 : index
    %373 = memref.load %arg3[%c24_79] : memref<32xf32, #tpu.memory_space<smem>>
    %374 = vector.broadcast %373 : f32 to vector<8x128xf32>
    %375 = arith.mulf %372, %374 : vector<8x128xf32>
    %376 = arith.addf %361, %375 : vector<8x128xf32>
    %c24_80 = arith.constant 24 : index
    %377 = memref.load %arg4[%c24_80] : memref<32xf32, #tpu.memory_space<smem>>
    %378 = vector.broadcast %377 : f32 to vector<8x128xf32>
    %379 = arith.mulf %372, %378 : vector<8x128xf32>
    %380 = arith.addf %365, %379 : vector<8x128xf32>
    %c25 = arith.constant 25 : index
    %381 = memref.load %arg1[%c25] : memref<32xf32, #tpu.memory_space<smem>>
    %382 = vector.broadcast %381 : f32 to vector<8x128xf32>
    %383 = arith.mulf %1, %382 : vector<8x128xf32>
    %c25_81 = arith.constant 25 : index
    %384 = memref.load %arg2[%c25_81] : memref<32xf32, #tpu.memory_space<smem>>
    %385 = vector.broadcast %384 : f32 to vector<8x128xf32>
    %386 = arith.addf %383, %385 : vector<8x128xf32>
    %387 = math.tanh %386 : vector<8x128xf32>
    %c25_82 = arith.constant 25 : index
    %388 = memref.load %arg3[%c25_82] : memref<32xf32, #tpu.memory_space<smem>>
    %389 = vector.broadcast %388 : f32 to vector<8x128xf32>
    %390 = arith.mulf %387, %389 : vector<8x128xf32>
    %391 = arith.addf %376, %390 : vector<8x128xf32>
    %c25_83 = arith.constant 25 : index
    %392 = memref.load %arg4[%c25_83] : memref<32xf32, #tpu.memory_space<smem>>
    %393 = vector.broadcast %392 : f32 to vector<8x128xf32>
    %394 = arith.mulf %387, %393 : vector<8x128xf32>
    %395 = arith.addf %380, %394 : vector<8x128xf32>
    %c26 = arith.constant 26 : index
    %396 = memref.load %arg1[%c26] : memref<32xf32, #tpu.memory_space<smem>>
    %397 = vector.broadcast %396 : f32 to vector<8x128xf32>
    %398 = arith.mulf %1, %397 : vector<8x128xf32>
    %c26_84 = arith.constant 26 : index
    %399 = memref.load %arg2[%c26_84] : memref<32xf32, #tpu.memory_space<smem>>
    %400 = vector.broadcast %399 : f32 to vector<8x128xf32>
    %401 = arith.addf %398, %400 : vector<8x128xf32>
    %402 = math.tanh %401 : vector<8x128xf32>
    %c26_85 = arith.constant 26 : index
    %403 = memref.load %arg3[%c26_85] : memref<32xf32, #tpu.memory_space<smem>>
    %404 = vector.broadcast %403 : f32 to vector<8x128xf32>
    %405 = arith.mulf %402, %404 : vector<8x128xf32>
    %406 = arith.addf %391, %405 : vector<8x128xf32>
    %c26_86 = arith.constant 26 : index
    %407 = memref.load %arg4[%c26_86] : memref<32xf32, #tpu.memory_space<smem>>
    %408 = vector.broadcast %407 : f32 to vector<8x128xf32>
    %409 = arith.mulf %402, %408 : vector<8x128xf32>
    %410 = arith.addf %395, %409 : vector<8x128xf32>
    %c27 = arith.constant 27 : index
    %411 = memref.load %arg1[%c27] : memref<32xf32, #tpu.memory_space<smem>>
    %412 = vector.broadcast %411 : f32 to vector<8x128xf32>
    %413 = arith.mulf %1, %412 : vector<8x128xf32>
    %c27_87 = arith.constant 27 : index
    %414 = memref.load %arg2[%c27_87] : memref<32xf32, #tpu.memory_space<smem>>
    %415 = vector.broadcast %414 : f32 to vector<8x128xf32>
    %416 = arith.addf %413, %415 : vector<8x128xf32>
    %417 = math.tanh %416 : vector<8x128xf32>
    %c27_88 = arith.constant 27 : index
    %418 = memref.load %arg3[%c27_88] : memref<32xf32, #tpu.memory_space<smem>>
    %419 = vector.broadcast %418 : f32 to vector<8x128xf32>
    %420 = arith.mulf %417, %419 : vector<8x128xf32>
    %421 = arith.addf %406, %420 : vector<8x128xf32>
    %c27_89 = arith.constant 27 : index
    %422 = memref.load %arg4[%c27_89] : memref<32xf32, #tpu.memory_space<smem>>
    %423 = vector.broadcast %422 : f32 to vector<8x128xf32>
    %424 = arith.mulf %417, %423 : vector<8x128xf32>
    %425 = arith.addf %410, %424 : vector<8x128xf32>
    %c28 = arith.constant 28 : index
    %426 = memref.load %arg1[%c28] : memref<32xf32, #tpu.memory_space<smem>>
    %427 = vector.broadcast %426 : f32 to vector<8x128xf32>
    %428 = arith.mulf %1, %427 : vector<8x128xf32>
    %c28_90 = arith.constant 28 : index
    %429 = memref.load %arg2[%c28_90] : memref<32xf32, #tpu.memory_space<smem>>
    %430 = vector.broadcast %429 : f32 to vector<8x128xf32>
    %431 = arith.addf %428, %430 : vector<8x128xf32>
    %432 = math.tanh %431 : vector<8x128xf32>
    %c28_91 = arith.constant 28 : index
    %433 = memref.load %arg3[%c28_91] : memref<32xf32, #tpu.memory_space<smem>>
    %434 = vector.broadcast %433 : f32 to vector<8x128xf32>
    %435 = arith.mulf %432, %434 : vector<8x128xf32>
    %436 = arith.addf %421, %435 : vector<8x128xf32>
    %c28_92 = arith.constant 28 : index
    %437 = memref.load %arg4[%c28_92] : memref<32xf32, #tpu.memory_space<smem>>
    %438 = vector.broadcast %437 : f32 to vector<8x128xf32>
    %439 = arith.mulf %432, %438 : vector<8x128xf32>
    %440 = arith.addf %425, %439 : vector<8x128xf32>
    %c29 = arith.constant 29 : index
    %441 = memref.load %arg1[%c29] : memref<32xf32, #tpu.memory_space<smem>>
    %442 = vector.broadcast %441 : f32 to vector<8x128xf32>
    %443 = arith.mulf %1, %442 : vector<8x128xf32>
    %c29_93 = arith.constant 29 : index
    %444 = memref.load %arg2[%c29_93] : memref<32xf32, #tpu.memory_space<smem>>
    %445 = vector.broadcast %444 : f32 to vector<8x128xf32>
    %446 = arith.addf %443, %445 : vector<8x128xf32>
    %447 = math.tanh %446 : vector<8x128xf32>
    %c29_94 = arith.constant 29 : index
    %448 = memref.load %arg3[%c29_94] : memref<32xf32, #tpu.memory_space<smem>>
    %449 = vector.broadcast %448 : f32 to vector<8x128xf32>
    %450 = arith.mulf %447, %449 : vector<8x128xf32>
    %451 = arith.addf %436, %450 : vector<8x128xf32>
    %c29_95 = arith.constant 29 : index
    %452 = memref.load %arg4[%c29_95] : memref<32xf32, #tpu.memory_space<smem>>
    %453 = vector.broadcast %452 : f32 to vector<8x128xf32>
    %454 = arith.mulf %447, %453 : vector<8x128xf32>
    %455 = arith.addf %440, %454 : vector<8x128xf32>
    %c30 = arith.constant 30 : index
    %456 = memref.load %arg1[%c30] : memref<32xf32, #tpu.memory_space<smem>>
    %457 = vector.broadcast %456 : f32 to vector<8x128xf32>
    %458 = arith.mulf %1, %457 : vector<8x128xf32>
    %c30_96 = arith.constant 30 : index
    %459 = memref.load %arg2[%c30_96] : memref<32xf32, #tpu.memory_space<smem>>
    %460 = vector.broadcast %459 : f32 to vector<8x128xf32>
    %461 = arith.addf %458, %460 : vector<8x128xf32>
    %462 = math.tanh %461 : vector<8x128xf32>
    %c30_97 = arith.constant 30 : index
    %463 = memref.load %arg3[%c30_97] : memref<32xf32, #tpu.memory_space<smem>>
    %464 = vector.broadcast %463 : f32 to vector<8x128xf32>
    %465 = arith.mulf %462, %464 : vector<8x128xf32>
    %466 = arith.addf %451, %465 : vector<8x128xf32>
    %c30_98 = arith.constant 30 : index
    %467 = memref.load %arg4[%c30_98] : memref<32xf32, #tpu.memory_space<smem>>
    %468 = vector.broadcast %467 : f32 to vector<8x128xf32>
    %469 = arith.mulf %462, %468 : vector<8x128xf32>
    %470 = arith.addf %455, %469 : vector<8x128xf32>
    %c31 = arith.constant 31 : index
    %471 = memref.load %arg1[%c31] : memref<32xf32, #tpu.memory_space<smem>>
    %472 = vector.broadcast %471 : f32 to vector<8x128xf32>
    %473 = arith.mulf %1, %472 : vector<8x128xf32>
    %c31_99 = arith.constant 31 : index
    %474 = memref.load %arg2[%c31_99] : memref<32xf32, #tpu.memory_space<smem>>
    %475 = vector.broadcast %474 : f32 to vector<8x128xf32>
    %476 = arith.addf %473, %475 : vector<8x128xf32>
    %477 = math.tanh %476 : vector<8x128xf32>
    %c31_100 = arith.constant 31 : index
    %478 = memref.load %arg3[%c31_100] : memref<32xf32, #tpu.memory_space<smem>>
    %479 = vector.broadcast %478 : f32 to vector<8x128xf32>
    %480 = arith.mulf %477, %479 : vector<8x128xf32>
    %481 = arith.addf %466, %480 : vector<8x128xf32>
    %c31_101 = arith.constant 31 : index
    %482 = memref.load %arg4[%c31_101] : memref<32xf32, #tpu.memory_space<smem>>
    %483 = vector.broadcast %482 : f32 to vector<8x128xf32>
    %484 = arith.mulf %477, %483 : vector<8x128xf32>
    %485 = arith.addf %470, %484 : vector<8x128xf32>
    %486 = math.exp %481 : vector<8x128xf32>
    %487 = arith.mulf %0, %486 : vector<8x128xf32>
    %488 = arith.addf %487, %485 : vector<8x128xf32>
    %cst = arith.constant 0.000000e+00 : f32
    %489 = vector.broadcast %cst : f32 to vector<8x128xf32>
    %490 = arith.maximumf %488, %489 : vector<8x128xf32>
    %491 = vector.broadcast %cst : f32 to vector<8x128xf32>
    %492 = arith.subf %488, %491 : vector<8x128xf32>
    %493 = arith.cmpf one, %492, %492 : vector<8x128xf32>
    %494 = vector.broadcast %cst : f32 to vector<8x128xf32>
    %495 = arith.addf %488, %494 : vector<8x128xf32>
    %496 = math.absf %492 : vector<8x128xf32>
    %cst_102 = arith.constant 0.000000e+00 : f32
    %497 = vector.broadcast %cst_102 : f32 to vector<8x128xf32>
    %498 = arith.subf %497, %496 : vector<8x128xf32>
    %499 = math.exp %498 : vector<8x128xf32>
    %500 = math.log1p %499 : vector<8x128xf32>
    %501 = arith.addf %490, %500 : vector<8x128xf32>
    %502 = arith.select %493, %495, %501 : vector<8x128xi1>, vector<8x128xf32>
    %503 = arith.subf %488, %502 : vector<8x128xf32>
    %504 = math.exp %503 : vector<8x128xf32>
    %505 = arith.addf %481, %488 : vector<8x128xf32>
    %cst_103 = arith.constant 2.000000e+00 : f32
    %506 = vector.broadcast %cst_103 : f32 to vector<8x128xf32>
    %507 = arith.mulf %506, %502 : vector<8x128xf32>
    %508 = arith.subf %505, %507 : vector<8x128xf32>
    %cst_104 = arith.constant 0.000000e+00 : f32
    %509 = vector.broadcast %cst_104 : f32 to vector<8x128xf32>
    %510 = arith.cmpf oge, %504, %509 : vector<8x128xf32>
    %cst_105 = arith.constant 1.000000e+00 : f32
    %511 = vector.broadcast %cst_105 : f32 to vector<8x128xf32>
    %512 = arith.cmpf ole, %504, %511 : vector<8x128xf32>
    %513 = arith.andi %510, %512 : vector<8x128xi1>
    %cst_106 = arith.constant 0xFF800000 : f32
    %514 = vector.broadcast %cst_106 : f32 to vector<8x128xf32>
    %515 = arith.select %513, %508, %514 : vector<8x128xi1>, vector<8x128xf32>
    %c0_107 = arith.constant 0 : index
    %c0_108 = arith.constant 0 : index
    %516 = vector.load %arg8[%c0_107, %c0_108] : memref<8x128xf32, #tpu.memory_space<vmem>>, vector<8x128xf32>
    tpu.vector_store %arg8[%c0_107, %c0_108], %504 {strides = array<i32>} : memref<8x128xf32, #tpu.memory_space<vmem>>, vector<8x128xf32>,
    %c0_109 = arith.constant 0 : index
    %c0_110 = arith.constant 0 : index
    %517 = vector.load %arg9[%c0_109, %c0_110] : memref<8x128xf32, #tpu.memory_space<vmem>>, vector<8x128xf32>
    tpu.vector_store %arg9[%c0_109, %c0_110], %515 {strides = array<i32>} : memref<8x128xf32, #tpu.memory_space<vmem>>, vector<8x128xf32>,
    return
  }
  func.func @transform_0(%arg0: i32) -> i32 {
    %c0_i32 = arith.constant 0 : i32
    %c0_i32_0 = arith.constant 0 : i32
    return %c0_i32 : i32
  }
  func.func @transform_1(%arg0: i32) -> i32 {
    %c0_i32 = arith.constant 0 : i32
    %c0_i32_0 = arith.constant 0 : i32
    return %c0_i32 : i32
  }
  func.func @transform_2(%arg0: i32) -> i32 {
    %c0_i32 = arith.constant 0 : i32
    %c0_i32_0 = arith.constant 0 : i32
    return %c0_i32 : i32
  }
  func.func @transform_3(%arg0: i32) -> i32 {
    %c0_i32 = arith.constant 0 : i32
    %c0_i32_0 = arith.constant 0 : i32
    return %c0_i32 : i32
  }
  func.func @transform_4(%arg0: i32) -> i32 {
    %c0_i32 = arith.constant 0 : i32
    %c0_i32_0 = arith.constant 0 : i32
    return %c0_i32 : i32
  }
  func.func @transform_5(%arg0: i32) -> (i32, i32) {
    %c0_i32 = arith.constant 0 : i32
    %c0_i32_0 = arith.constant 0 : i32
    return %arg0, %c0_i32 : i32, i32
  }
  func.func @transform_6(%arg0: i32) -> (i32, i32) {
    %c0_i32 = arith.constant 0 : i32
    %c0_i32_0 = arith.constant 0 : i32
    return %arg0, %c0_i32 : i32, i32
  }
  func.func @transform_7(%arg0: i32) -> (i32, i32) {
    %c0_i32 = arith.constant 0 : i32
    %c0_i32_0 = arith.constant 0 : i32
    return %arg0, %c0_i32 : i32, i32
  }
  func.func @transform_8(%arg0: i32) -> (i32, i32) {
    %c0_i32 = arith.constant 0 : i32
    %c0_i32_0 = arith.constant 0 : i32
    return %arg0, %c0_i32 : i32, i32
  }
}

</mosaic_0001>

<bundles_post_ra>
// kernel: tpu_custom_call.1
= control target key start
LH: loop header
LB: loop body
LE: loop exit
PB: predicated region body
PF: predicated region fallthrough
CT: control target
= control target key end

     0   :  { %14 = vsyncpa [#allocation4], 0  ;;  %s1466_s0 = inlined_call_operand.hbm [shape: f32[32], index: 0, kind: input, shape index: {}]   ;;  %s1467_s1 = inlined_call_operand.vmem [shape: f32[32], index: 1, kind: input, shape index: {}]   ;;  %s1468_s2 = inlined_call_operand.vmem [shape: f32[32], index: 2, kind: input, shape index: {}]   ;;  %s1469_s3 = inlined_call_operand.hbm [shape: f32[32], index: 3, kind: input, shape index: {}]   ;;  %s1470_s4 = inlined_call_operand.hbm [shape: f32[2], index: 4, kind: input, shape index: {}]   ;;  %s1471_s5 = inlined_call_operand.vmem [shape: f32[8,128], index: 5, kind: input, shape index: {}]   ;;  %s1472_s6 = inlined_call_operand.vmem [shape: f32[8,128], index: 6, kind: input, shape index: {}]   ;;  %s1473_s7 = inlined_call_operand.hbm [shape: f32[8,128], index: 7, kind: output, shape index: {0}]   ;;  %s1474_s8 = inlined_call_operand.hbm [shape: f32[8,128], index: 8, kind: output, shape index: {1}]  }
   0x1   :  { %15 = vsyncpa [#allocation5], 0 }
   0x2   :  { %16 = vsyncpa [#allocation8], 0 }
   0x3   :  { %17 = vsyncpa [#allocation10], 0 }
   0x4   :  { %18 = vsyncpa [#allocation3], 0 }
   0x5   :  { %19 = vsyncpa [#allocation14], 0  ;;  %s840_s29 = scalar_lea.hbm %s1469_s3, 16 }
   0x6   :  { %p841_p0 = scmp.ne.s32.totalorder %s1469_s3, %s840_s29  ;;  %p844_p1 = scmp.lt.u32.totalorder %s840_s29, %s1469_s3 }
   0x8   :  { %p846_p2 = pnand %p844_p1, %p841_p0 }
   0xa   :  { %849 = shalt.err (!%p846_p2)
}
   0xb   :  { %s950_s12 = smov [#allocation9]   ;;  %s850_s17 = scalar_lea.hbm %s1466_s0, 16 }
   0xc   :  { %55 = dma.hbm_to_smem %s1469_s3, 16, %s950_s12, [#allocation10]  }
   0xd   :  { %p851_p3 = scmp.ne.s32.totalorder %s1466_s0, %s850_s17  ;;  %p854_p4 = scmp.lt.u32.totalorder %s850_s17, %s1466_s0 }
   0xf   :  { %p856_p5 = pnand %p854_p4, %p851_p3 }
  0x11   :  { %859 = shalt.err (!%p856_p5)
}
  0x12   :  { %s951_s22 = smov [#allocation2]   ;;  %s34_s26 = sshll.u32 %s1467_s1, 4  ;;  %s35_s26 = int_to_ptr.vmem [resolvable:$true] %s34_s26 }
  0x13   :  { %27 = dma.hbm_to_smem %s1466_s0, 16, %s951_s22, [#allocation4]  }
  0x14   :  { %s44_s29 = sshll.u32 %s1468_s2, 4  ;;  %s860_s30 = scalar_lea.vmem %s35_s26, 16  ;;  %s45_s29 = int_to_ptr.vmem [resolvable:$true] %s44_s29 }
  0x15   :  { %p861_p6 = scmp.ne.s32.totalorder %s35_s26, %s860_s30  ;;  %p865_p7 = scmp.lt.s32.totalorder %s35_s26, %s35_s26 }
  0x16   :  { %p866_p8 = scmp.lt.s32.totalorder %s860_s30, %s860_s30 }
  0x18   :  { %p867_p9 = por %p866_p8, %p865_p7 }
  0x1a   :  { %p868_p10 = pnand %p867_p9, %p861_p6 }
  0x1c   :  { %871 = shalt.err (!%p868_p10)
}
  0x1d   :  { %s952_s9 = smov [#allocation6]   ;;  %s872_s0 = scalar_lea.vmem %s45_s29, 16 }
  0x1e   :  { %37 = dma.vmem_to_smem %s35_s26, 16, %s952_s9, [#allocation5]  }
  0x1f   :  { %p873_p11 = scmp.ne.s32.totalorder %s45_s29, %s872_s0  ;;  %p877_p12 = scmp.lt.s32.totalorder %s45_s29, %s45_s29 }
  0x20   :  { %p878_p13 = scmp.lt.s32.totalorder %s872_s0, %s872_s0 }
  0x22   :  { %p879_p0 = por %p878_p13, %p877_p12 }
  0x24   :  { %p880_p1 = pnand %p879_p0, %p873_p11 }
  0x26   :  { %883 = shalt.err (!%p880_p1)
}
  0x27   :  { %s953_s1 = smov [#allocation7]   ;;  %s884_s11 = scalar_lea.hbm %s1470_s4, 16 }
  0x28   :  { %47 = dma.vmem_to_smem %s45_s29, 16, %s953_s1, [#allocation8]  }
  0x29   :  { %p885_p2 = scmp.ne.s32.totalorder %s1470_s4, %s884_s11  ;;  %p888_p3 = scmp.lt.u32.totalorder %s884_s11, %s1470_s4 }
  0x2b   :  { %p890_p4 = pnand %p888_p3, %p885_p2 }
  0x2d   :  { %893 = shalt.err (!%p890_p4)
}
  0x2e   :  { %s954_s16 = smov [#allocation11]  }
  0x2f   :  { %63 = dma.hbm_to_smem %s1470_s4, 16, %s954_s16, [#allocation10]  }
  0x30   :  { %938 = dma.done.wait [#allocation4], 16  }
  0x31   :  { %939 = vsyncadd [#allocation4], 4294967280 }
  0x32   :  { %940 = dma.done.wait [#allocation5], 16  }
  0x33   :  { %941 = vsyncadd [#allocation5], 4294967280 }
  0x34   :  { %942 = dma.done.wait [#allocation8], 16  }
  0x35   :  { %943 = vsyncadd [#allocation8], 4294967280 }
  0x36   :  { %944 = dma.done.wait [#allocation10], 32  }
  0x37   :  { %945 = vsyncadd [#allocation10], 4294967264 }
  0x38   :  { %83 = sfence }
  0x39   :  { %s86_s19 = sld [smem:[#allocation2]]  ;;  %s637_s21 = sld [smem:[#allocation2 + $0x1]]  ;;  %v1047_v0 = vld [vmem:[%s1472_s6] sm:$0xff] }
  0x3a   :  { %s89_s20 = sld [smem:[#allocation6]]  ;;  %s638_s22 = sld [smem:[#allocation6 + $0x1]] }
  0x3b   :  { %s1049_s3 = sld [smem:[#allocation7]]  ;;  %s641_s4 = sld [smem:[#allocation2 + $0x2]] }
  0x3c   :  { %s1051_s25 = sld [smem:[#allocation6 + $0x2]]  ;;  %s1053_s26 = sld [smem:[#allocation11]] }
  0x3d   :  { %s1055_s27 = sld [smem:[#allocation9]]  ;;  %s645_s28 = sld [smem:[#allocation2 + $0x3]] }
  0x3e   :  { %s1058_s29 = sld [smem:[#allocation6 + $0x3]]  ;;  %s1060_s30 = sld [smem:[#allocation11 + $0x1]] }
  0x3f   :  { %v87_v1 = vstv %s86_s19  ;;  %s1062_s6 = sld [smem:[#allocation7 + $0x1]]  ;;  %v106_v5 = vstv %s637_s21  ;;  %s649_s9 = sld [smem:[#allocation2 + $0x4]] }
  0x40   :  { %v90_v2 = vstv %s89_s20  ;;  %v88_v3 = vmul.f32 %v87_v1, %v1047_v0  ;;  %v109_v6 = vstv %s638_s22  ;;  %s1064_s0 = sld [smem:[#allocation6 + $0x4]]  ;;  %v107_v7 = vmul.f32 %v106_v5, %v1047_v0  ;;  %s1067_s1 = sld [smem:[#allocation9 + $0x1]] }
  0x41   :  { %s1069_s2 = sld [smem:[#allocation7 + $0x2]]  ;;  %v121_v8 = vstv %s641_s4  ;;  %s1072_s10 = sld [smem:[#allocation2 + $0x5]]  ;;  %v94_v18 = vstv %s1049_s3 }
  0x42   :  { %v91_v4 = vadd.f32 %v90_v2, %v88_v3  ;;  %v124_v9 = vstv %s1051_s25  ;;  %s1074_s11 = sld [smem:[#allocation6 + $0x5]]  ;;  %v110_v10 = vadd.f32 %v109_v6, %v107_v7  ;;  %v122_v11 = vmul.f32 %v121_v8, %v1047_v0  ;;  %s1077_s12 = sld [smem:[#allocation9 + $0x2]] }
  0x43   :  { %s1079_s13 = sld [smem:[#allocation7 + $0x3]]  ;;  %v136_v12 = vstv %s645_s28  ;;  %s1082_s14 = sld [smem:[#allocation2 + $0x6]]  ;;  %v97_v21 = vstv %s1053_s26  ;;  %v100_v22 = vstv %s1055_s27 }
  0x44   :  { %768 = vtanh.f32 %v91_v4  ;;  %v139_v13 = vstv %s1058_s29  ;;  %s1084_s15 = sld [smem:[#allocation6 + $0x6]]  ;;  %v125_v14 = vadd.f32 %v124_v9, %v122_v11  ;;  %v137_v15 = vmul.f32 %v136_v12, %v1047_v0  ;;  %s1087_s16 = sld [smem:[#allocation9 + $0x3]] }
  0x45   :  { %770 = vtanh.f32 %v110_v10  ;;  %s1089_s17 = sld [smem:[#allocation7 + $0x4]]  ;;  %v151_v16 = vstv %s649_s9  ;;  %s1092_s18 = sld [smem:[#allocation2 + $0x7]]  ;;  %v103_v25 = vstv %s1060_s30  ;;  %v113_v28 = vstv %s1062_s6 }
  0x46   :  { %v154_v17 = vstv %s1064_s0  ;;  %s1094_s19 = sld [smem:[#allocation6 + $0x7]]  ;;  %772 = vtanh.f32 %v125_v14  ;;  %v140_v19 = vadd.f32 %v139_v13, %v137_v15  ;;  %v152_v20 = vmul.f32 %v151_v16, %v1047_v0  ;;  %s1102_s20 = sld [smem:[#allocation2 + $0x8]] }
  0x47   :  { %v166_v23 = vstv %s1072_s10  ;;  %s1104_s21 = sld [smem:[#allocation6 + $0x8]]  ;;  %s1107_s22 = sld [smem:[#allocation9 + $0x4]]  ;;  %v117_v29 = vstv %s1067_s1  ;;  %v128_v32 = vstv %s1069_s2 }
  0x48   :  { %v169_v24 = vstv %s1074_s11  ;;  %774 = vtanh.f32 %v140_v19  ;;  %v155_v26 = vadd.f32 %v154_v17, %v152_v20  ;;  %v167_v27 = vmul.f32 %v166_v23, %v1047_v0  ;;  %s1110_s23 = sld [smem:[#allocation7 + $0x5]]  ;;  %s1116_s24 = sld [smem:[#allocation2 + $0x9]] }
  0x49   :  { %v181_v30 = vstv %s1082_s14  ;;  %s1119_s3 = sld [smem:[#allocation9 + $0x5]]  ;;  %s1122_s4 = sld [smem:[#allocation6 + $0x9]]  ;;  %v132_v36 = vstv %s1077_s12  ;;  %v143_v37 = vstv %s1079_s13 }
  0x4a   :  { %v184_v31 = vstv %s1084_s15  ;;  %776 = vtanh.f32 %v155_v26  ;;  %v170_v33 = vadd.f32 %v169_v24, %v167_v27  ;;  %v182_v34 = vmul.f32 %v181_v30, %v1047_v0  ;;  %s1128_s25 = sld [smem:[#allocation7 + $0x6]]  ;;  %s1130_s26 = sld [smem:[#allocation2 + $0xa]] }
  0x4b   :  { %v196_v38 = vstv %s1092_s18  ;;  %v147_v43 = vstv %s1087_s16  ;;  %v158_v44 = vstv %s1089_s17  ;;  %s1136_s27 = sld [smem:[#allocation9 + $0x6]]  ;;  %s1139_s28 = sld [smem:[#allocation6 + $0xa]] }
  0x4c   :  { %v199_v39 = vstv %s1094_s19  ;;  %778 = vtanh.f32 %v170_v33  ;;  %v185_v42 = vadd.f32 %v184_v31, %v182_v34  ;;  %v197_v45 = vmul.f32 %v196_v38, %v1047_v0  ;;  %s1141_s29 = sld [smem:[#allocation7 + $0x7]]  ;;  %s1147_s30 = sld [smem:[#allocation2 + $0xb]] }
  0x4d   :  { %v211_v46 = vstv %s1102_s20  ;;  %v214_v54 = vstv %s1104_s21  ;;  %v162_v56 = vstv %s1107_s22  ;;  %s1149_s6 = sld [smem:[#allocation6 + $0xb]]  ;;  %s1152_s9 = sld [smem:[#allocation9 + $0x7]] }
  0x4e   :  { %v769_v35 = vpop.eup %768  ;;  %780 = vtanh.f32 %v185_v42  ;;  %v212_v50 = vmul.f32 %v211_v46, %v1047_v0  ;;  %v200_v53 = vadd.f32 %v199_v39, %v197_v45  ;;  %v173_v57 = vstv %s1110_s23  ;;  %s1154_s0 = sld [smem:[#allocation7 + $0x8]]  ;;  %s1158_s1 = sld [smem:[#allocation2 + $0xc]] }
  0x4f   :  { %v95_v40 = vmul.f32 %v769_v35, %v94_v18  ;;  %v101_v41 = vmul.f32 %v769_v35, %v100_v22  ;;  %v771_v47 = vpop.eup %770  ;;  %v226_v59 = vstv %s1116_s24  ;;  %v177_v2 = vstv %s1119_s3  ;;  %s1160_s2 = sld [smem:[#allocation6 + $0xc]]  ;;  %s1163_s10 = sld [smem:[#allocation9 + $0x8]] }
  0x50   :  { %v114_v51 = vmul.f32 %v771_v47, %v113_v28  ;;  %v118_v52 = vmul.f32 %v771_v47, %v117_v29  ;;  %v773_v55 = vpop.eup %772  ;;  %v215_v58 = vadd.f32 %v214_v54, %v212_v50  ;;  %782 = vtanh.f32 %v200_v53  ;;  %s1165_s11 = sld [smem:[#allocation7 + $0x9]]  ;;  %s1168_s12 = sld [smem:[#allocation2 + $0xd]] }
  0x51   :  { %v98_v48 = vadd.f32 %v97_v21, %v95_v40  ;;  %v104_v49 = vadd.f32 %v103_v25, %v101_v41  ;;  %v129_v62 = vmul.f32 %v773_v55, %v128_v32  ;;  %v133_v63 = vmul.f32 %v773_v55, %v132_v36  ;;  %s1170_s13 = sld [smem:[#allocation6 + $0xd]]  ;;  %s1173_s14 = sld [smem:[#allocation9 + $0x9]] }
  0x52   :  { %v775_v1 = vpop.eup %774  ;;  %v227_v3 = vmul.f32 %v226_v59, %v1047_v0  ;;  %v229_v4 = vstv %s1122_s4  ;;  %v188_v10 = vstv %s1128_s25  ;;  %784 = vtanh.f32 %v215_v58  ;;  %s1178_s15 = sld [smem:[#allocation7 + $0xa]]  ;;  %s1182_s16 = sld [smem:[#allocation2 + $0xe]] }
  0x53   :  { %v115_v60 = vadd.f32 %v114_v51, %v98_v48  ;;  %v119_v61 = vadd.f32 %v118_v52, %v104_v49  ;;  %v144_v7 = vmul.f32 %v775_v1, %v143_v37  ;;  %v148_v8 = vmul.f32 %v775_v1, %v147_v43  ;;  %s1186_s17 = sld [smem:[#allocation9 + $0xa]]  ;;  %s1189_s18 = sld [smem:[#allocation6 + $0xe]] }
  0x54   :  { %v777_v9 = vpop.eup %776  ;;  %v230_v11 = vadd.f32 %v229_v4, %v227_v3  ;;  %v241_v12 = vstv %s1130_s26  ;;  %v192_v18 = vstv %s1136_s27  ;;  %v244_v20 = vstv %s1139_s28  ;;  %s1193_s19 = sld [smem:[#allocation2 + $0xf]]  ;;  %s1197_s20 = sld [smem:[#allocation7 + $0xb]] }
  0x55   :  { %v130_v5 = vadd.f32 %v129_v62, %v115_v60  ;;  %v134_v6 = vadd.f32 %v133_v63, %v119_v61  ;;  %v159_v15 = vmul.f32 %v777_v9, %v158_v44  ;;  %v163_v16 = vmul.f32 %v777_v9, %v162_v56  ;;  %s1200_s21 = sld [smem:[#allocation6 + $0xf]]  ;;  %s1202_s22 = sld [smem:[#allocation9 + $0xb]] }
  0x56   :  { %v779_v17 = vpop.eup %778  ;;  %786 = vtanh.f32 %v230_v11  ;;  %v242_v19 = vmul.f32 %v241_v12, %v1047_v0  ;;  %v203_v26 = vstv %s1141_s29  ;;  %v256_v28 = vstv %s1147_s30  ;;  %s1206_s23 = sld [smem:[#allocation2 + $0x10]]  ;;  %s1212_s3 = sld [smem:[#allocation7 + $0xc]] }
  0x57   :  { %v145_v13 = vadd.f32 %v144_v7, %v130_v5  ;;  %v149_v14 = vadd.f32 %v148_v8, %v134_v6  ;;  %v174_v23 = vmul.f32 %v779_v17, %v173_v57  ;;  %v178_v24 = vmul.f32 %v779_v17, %v177_v2  ;;  %s1210_s24 = sld [smem:[#allocation6 + $0x10]]  ;;  %s1214_s4 = sld [smem:[#allocation9 + $0xc]] }
  0x58   :  { %v781_v25 = vpop.eup %780  ;;  %v245_v27 = vadd.f32 %v244_v20, %v242_v19  ;;  %v259_v29 = vstv %s1149_s6  ;;  %v207_v34 = vstv %s1152_s9  ;;  %v218_v35 = vstv %s1154_s0  ;;  %s1217_s25 = sld [smem:[#allocation7 + $0xd]]  ;;  %s1220_s26 = sld [smem:[#allocation2 + $0x11]] }
  0x59   :  { %v160_v21 = vadd.f32 %v159_v15, %v145_v13  ;;  %v164_v22 = vadd.f32 %v163_v16, %v149_v14  ;;  %v189_v32 = vmul.f32 %v781_v25, %v188_v10  ;;  %v193_v33 = vmul.f32 %v781_v25, %v192_v18  ;;  %s1222_s27 = sld [smem:[#allocation9 + $0xd]]  ;;  %s1224_s28 = sld [smem:[#allocation6 + $0x11]] }
  0x5a   :  { %788 = vtanh.f32 %v245_v27  ;;  %v257_v36 = vmul.f32 %v256_v28, %v1047_v0  ;;  %v271_v39 = vstv %s1158_s1  ;;  %v274_v40 = vstv %s1160_s2  ;;  %v783_v41 = vpop.eup %782  ;;  %s1229_s29 = sld [smem:[#allocation2 + $0x12]]  ;;  %s1235_s6 = sld [smem:[#allocation7 + $0xe]] }
  0x5b   :  { %v175_v30 = vadd.f32 %v174_v23, %v160_v21  ;;  %v179_v31 = vadd.f32 %v178_v24, %v164_v22  ;;  %v222_v42 = vstv %s1163_s10  ;;  %v233_v43 = vstv %s1165_s11  ;;  %s1231_s30 = sld [smem:[#allocation6 + $0x12]]  ;;  %s1237_s9 = sld [smem:[#allocation9 + $0xe]] }
  0x5c   :  { %v260_v44 = vadd.f32 %v259_v29, %v257_v36  ;;  %v272_v45 = vmul.f32 %v271_v39, %v1047_v0  ;;  %v204_v46 = vmul.f32 %v783_v41, %v203_v26  ;;  %v208_v47 = vmul.f32 %v783_v41, %v207_v34  ;;  %v785_v50 = vpop.eup %784  ;;  %s1245_s0 = sld [smem:[#allocation2 + $0x13]]  ;;  %s1251_s2 = sld [smem:[#allocation7 + $0xf]] }
  0x5d   :  { %v190_v37 = vadd.f32 %v189_v32, %v175_v30  ;;  %v194_v38 = vadd.f32 %v193_v33, %v179_v31  ;;  %v286_v48 = vstv %s1168_s12  ;;  %v289_v49 = vstv %s1170_s13  ;;  %s1247_s1 = sld [smem:[#allocation6 + $0x13]]  ;;  %s1253_s10 = sld [smem:[#allocation9 + $0xf]] }
  0x5e   :  { %v237_v51 = vstv %s1173_s14  ;;  %790 = vtanh.f32 %v260_v44  ;;  %v275_v52 = vadd.f32 %v274_v40, %v272_v45  ;;  %v287_v53 = vmul.f32 %v286_v48, %v1047_v0  ;;  %s1257_s11 = sld [smem:[#allocation2 + $0x14]]  ;;  %s1261_s13 = sld [smem:[#allocation7 + $0x10]] }
  0x5f   :  { %v205_v54 = vadd.f32 %v204_v46, %v190_v37  ;;  %v209_v55 = vadd.f32 %v208_v47, %v194_v38  ;;  %v219_v56 = vmul.f32 %v785_v50, %v218_v35  ;;  %v223_v57 = vmul.f32 %v785_v50, %v222_v42  ;;  %s1259_s12 = sld [smem:[#allocation6 + $0x14]]  ;;  %s1263_s14 = sld [smem:[#allocation9 + $0x10]] }
  0x60   :  { %v787_v58 = vpop.eup %786  ;;  %v248_v59 = vstv %s1178_s15  ;;  %792 = vtanh.f32 %v275_v52  ;;  %v290_v60 = vadd.f32 %v289_v49, %v287_v53  ;;  %v301_v61 = vstv %s1182_s16  ;;  %s1270_s15 = sld [smem:[#allocation2 + $0x15]] }
  0x61   :  { %v220_v62 = vadd.f32 %v219_v56, %v205_v54  ;;  %v224_v63 = vadd.f32 %v223_v57, %v209_v55  ;;  %v234_v1 = vmul.f32 %v787_v58, %v233_v43  ;;  %v238_v2 = vmul.f32 %v787_v58, %v237_v51  ;;  %s1272_s16 = sld [smem:[#allocation6 + $0x15]] }
  0x62   :  { %v252_v3 = vstv %s1186_s17  ;;  %794 = vtanh.f32 %v290_v60  ;;  %v302_v4 = vmul.f32 %v301_v61, %v1047_v0  ;;  %v304_v5 = vstv %s1189_s18  ;;  %s1276_s17 = sld [smem:[#allocation7 + $0x11]] }
  0x63   :  { %v235_v6 = vadd.f32 %v234_v1, %v220_v62  ;;  %v239_v7 = vadd.f32 %v238_v2, %v224_v63  ;;  %v316_v8 = vstv %s1193_s19  ;;  %v263_v10 = vstv %s1197_s20  ;;  %s1279_s18 = sld [smem:[#allocation9 + $0x11]]  ;;  %s1283_s19 = sld [smem:[#allocation2 + $0x16]] }
  0x64   :  { %v789_v9 = vpop.eup %788  ;;  %v305_v11 = vadd.f32 %v304_v5, %v302_v4  ;;  %v317_v12 = vmul.f32 %v316_v8, %v1047_v0  ;;  %v319_v13 = vstv %s1200_s21  ;;  %v267_v16 = vstv %s1202_s22  ;;  %s1286_s20 = sld [smem:[#allocation7 + $0x12]]  ;;  %s1289_s21 = sld [smem:[#allocation6 + $0x16]] }
  0x65   :  { %v249_v14 = vmul.f32 %v789_v9, %v248_v59  ;;  %v253_v15 = vmul.f32 %v789_v9, %v252_v3  ;;  %v331_v17 = vstv %s1206_s23  ;;  %v334_v20 = vstv %s1210_s24  ;;  %s1292_s22 = sld [smem:[#allocation9 + $0x12]]  ;;  %s1296_s23 = sld [smem:[#allocation2 + $0x17]] }
  0x66   :  { %796 = vtanh.f32 %v305_v11  ;;  %v320_v18 = vadd.f32 %v319_v13, %v317_v12  ;;  %v332_v19 = vmul.f32 %v331_v17, %v1047_v0  ;;  %v278_v23 = vstv %s1212_s3  ;;  %s1298_s24 = sld [smem:[#allocation7 + $0x13]] }
  0x67   :  { %v250_v21 = vadd.f32 %v249_v14, %v235_v6  ;;  %v254_v22 = vadd.f32 %v253_v15, %v239_v7  ;;  %v282_v24 = vstv %s1214_s4  ;;  %v293_v26 = vstv %s1217_s25  ;;  %s1300_s3 = sld [smem:[#allocation9 + $0x13]]  ;;  %s1307_s4 = sld [smem:[#allocation6 + $0x17]] }
  0x68   :  { %v791_v25 = vpop.eup %790  ;;  %798 = vtanh.f32 %v320_v18  ;;  %v335_v27 = vadd.f32 %v334_v20, %v332_v19  ;;  %v346_v28 = vstv %s1220_s26  ;;  %v349_v32 = vstv %s1224_s28  ;;  %s1309_s25 = sld [smem:[#allocation2 + $0x18]]  ;;  %s1317_s28 = sld [smem:[#allocation9 + $0x14]] }
  0x69   :  { %v264_v29 = vmul.f32 %v791_v25, %v263_v10  ;;  %v268_v30 = vmul.f32 %v791_v25, %v267_v16  ;;  %v347_v31 = vmul.f32 %v346_v28, %v1047_v0  ;;  %v297_v34 = vstv %s1222_s27  ;;  %s1313_s26 = sld [smem:[#allocation6 + $0x18]]  ;;  %s1315_s27 = sld [smem:[#allocation7 + $0x14]] }
  0x6a   :  { %v793_v33 = vpop.eup %792  ;;  %800 = vtanh.f32 %v335_v27  ;;  %v361_v35 = vstv %s1229_s29  ;;  %v364_v36 = vstv %s1231_s30  ;;  %v308_v42 = vstv %s1235_s6  ;;  %s1320_s29 = sld [smem:[#allocation7 + $0x15]]  ;;  %s1323_s30 = sld [smem:[#allocation2 + $0x19]] }
  0x6b   :  { %v265_v37 = vadd.f32 %v264_v29, %v250_v21  ;;  %v269_v38 = vadd.f32 %v268_v30, %v254_v22  ;;  %v279_v39 = vmul.f32 %v793_v33, %v278_v23  ;;  %v283_v40 = vmul.f32 %v793_v33, %v282_v24  ;;  %s1325_s6 = sld [smem:[#allocation9 + $0x15]] }
  0x6c   :  { %v795_v41 = vpop.eup %794  ;;  %v312_v43 = vstv %s1237_s9  ;;  %v350_v44 = vadd.f32 %v349_v32, %v347_v31  ;;  %v362_v45 = vmul.f32 %v361_v35, %v1047_v0  ;;  %v376_v51 = vstv %s1245_s0  ;;  %s1329_s9 = sld [smem:[#allocation6 + $0x19]]  ;;  %s1334_s0 = sld [smem:[#allocation2 + $0x1a]] }
  0x6d   :  { %v280_v46 = vadd.f32 %v279_v39, %v265_v37  ;;  %v284_v47 = vadd.f32 %v283_v40, %v269_v38  ;;  %v294_v48 = vmul.f32 %v795_v41, %v293_v26  ;;  %v298_v49 = vmul.f32 %v795_v41, %v297_v34 }
  0x6e   :  { %802 = vtanh.f32 %v350_v44  ;;  %v365_v50 = vadd.f32 %v364_v36, %v362_v45  ;;  %v379_v52 = vstv %s1247_s1  ;;  %v323_v55 = vstv %s1251_s2  ;;  %s1336_s1 = sld [smem:[#allocation6 + $0x1a]]  ;;  %s1341_s2 = sld [smem:[#allocation7 + $0x16]] }
  0x6f   :  { %v295_v53 = vadd.f32 %v294_v48, %v280_v46  ;;  %v299_v54 = vadd.f32 %v298_v49, %v284_v47  ;;  %v377_v56 = vmul.f32 %v376_v51, %v1047_v0  ;;  %v327_v58 = vstv %s1253_s10  ;;  %s1343_s10 = sld [smem:[#allocation9 + $0x16]] }
  0x70   :  { %v797_v57 = vpop.eup %796  ;;  %804 = vtanh.f32 %v365_v50  ;;  %v391_v59 = vstv %s1257_s11  ;;  %v394_v60 = vstv %s1259_s12  ;;  %v338_v3 = vstv %s1261_s13  ;;  %s1349_s11 = sld [smem:[#allocation2 + $0x1b]]  ;;  %s1355_s13 = sld [smem:[#allocation7 + $0x17]] }
  0x71   :  { %v309_v61 = vmul.f32 %v797_v57, %v308_v42  ;;  %v313_v62 = vmul.f32 %v797_v57, %v312_v43  ;;  %v380_v63 = vadd.f32 %v379_v52, %v377_v56  ;;  %v392_v1 = vmul.f32 %v391_v59, %v1047_v0  ;;  %s1351_s12 = sld [smem:[#allocation6 + $0x1b]] }
  0x72   :  { %v799_v2 = vpop.eup %798  ;;  %v342_v4 = vstv %s1263_s14  ;;  %v406_v5 = vstv %s1270_s15  ;;  %v409_v6 = vstv %s1272_s16  ;;  %v353_v12 = vstv %s1276_s17  ;;  %s1357_s14 = sld [smem:[#allocation9 + $0x17]]  ;;  %s1361_s15 = sld [smem:[#allocation2 + $0x1c]] }
  0x73   :  { %v310_v7 = vadd.f32 %v309_v61, %v295_v53  ;;  %v314_v8 = vadd.f32 %v313_v62, %v299_v54  ;;  %v324_v9 = vmul.f32 %v799_v2, %v323_v55  ;;  %v328_v10 = vmul.f32 %v799_v2, %v327_v58  ;;  %s1363_s16 = sld [smem:[#allocation6 + $0x1c]]  ;;  %s1368_s17 = sld [smem:[#allocation7 + $0x18]] }
  0x74   :  { %v801_v11 = vpop.eup %800  ;;  %806 = vtanh.f32 %v380_v63  ;;  %v395_v13 = vadd.f32 %v394_v60, %v392_v1  ;;  %v407_v14 = vmul.f32 %v406_v5, %v1047_v0  ;;  %v357_v19 = vstv %s1279_s18  ;;  %s1372_s18 = sld [smem:[#allocation2 + $0x1d]] }
  0x75   :  { %v325_v15 = vadd.f32 %v324_v9, %v310_v7  ;;  %v329_v16 = vadd.f32 %v328_v10, %v314_v8  ;;  %v339_v17 = vmul.f32 %v801_v11, %v338_v3  ;;  %v343_v18 = vmul.f32 %v801_v11, %v342_v4 }
  0x76   :  { %808 = vtanh.f32 %v395_v13  ;;  %v410_v20 = vadd.f32 %v409_v6, %v407_v14  ;;  %v421_v21 = vstv %s1283_s19  ;;  %v424_v25 = vstv %s1289_s21  ;;  %s1374_s19 = sld [smem:[#allocation6 + $0x1d]]  ;;  %s1381_s21 = sld [smem:[#allocation7 + $0x19]] }
  0x77   :  { %v340_v22 = vadd.f32 %v339_v17, %v325_v15  ;;  %v344_v23 = vadd.f32 %v343_v18, %v329_v16  ;;  %v422_v24 = vmul.f32 %v421_v21, %v1047_v0  ;;  %v368_v27 = vstv %s1286_s20  ;;  %s1379_s20 = sld [smem:[#allocation9 + $0x18]] }
  0x78   :  { %v803_v26 = vpop.eup %802  ;;  %v372_v28 = vstv %s1292_s22  ;;  %810 = vtanh.f32 %v410_v20  ;;  %v436_v29 = vstv %s1296_s23  ;;  %v383_v35 = vstv %s1298_s24  ;;  %s1385_s22 = sld [smem:[#allocation2 + $0x1e]]  ;;  %s1388_s23 = sld [smem:[#allocation7 + $0x1a]] }
  0x79   :  { %v354_v30 = vmul.f32 %v803_v26, %v353_v12  ;;  %v358_v31 = vmul.f32 %v803_v26, %v357_v19  ;;  %v425_v32 = vadd.f32 %v424_v25, %v422_v24  ;;  %v437_v33 = vmul.f32 %v436_v29, %v1047_v0  ;;  %s1391_s24 = sld [smem:[#allocation6 + $0x1e]] }
  0x7a   :  { %v805_v34 = vpop.eup %804  ;;  %v387_v36 = vstv %s1300_s3  ;;  %v439_v37 = vstv %s1307_s4  ;;  %v451_v38 = vstv %s1309_s25  ;;  %v454_v45 = vstv %s1313_s26  ;;  %s1396_s3 = sld [smem:[#allocation2 + $0x1f]]  ;;  %s1398_s4 = sld [smem:[#allocation9 + $0x19]] }
  0x7b   :  { %v355_v39 = vadd.f32 %v354_v30, %v340_v22  ;;  %v359_v40 = vadd.f32 %v358_v31, %v344_v23  ;;  %v369_v41 = vmul.f32 %v805_v34, %v368_v27  ;;  %v373_v42 = vmul.f32 %v805_v34, %v372_v28  ;;  %s1403_s25 = sld [smem:[#allocation6 + $0x1f]]  ;;  %s1405_s26 = sld [smem:[#allocation7 + $0x1b]] }
  0x7c   :  { %812 = vtanh.f32 %v425_v32  ;;  %v440_v43 = vadd.f32 %v439_v37, %v437_v33  ;;  %v452_v44 = vmul.f32 %v451_v38, %v1047_v0  ;;  %v398_v48 = vstv %s1315_s27  ;;  %s1410_s27 = sld [smem:[#allocation9 + $0x1a]] }
  0x7d   :  { %v370_v46 = vadd.f32 %v369_v41, %v355_v39  ;;  %v374_v47 = vadd.f32 %v373_v42, %v359_v40  ;;  %v402_v49 = vstv %s1317_s28  ;;  %v413_v51 = vstv %s1320_s29  ;;  %s1413_s28 = sld [smem:[#allocation7 + $0x1c]]  ;;  %s1419_s29 = sld [smem:[#allocation7 + $0x1d]] }
  0x7e   :  { %v807_v50 = vpop.eup %806  ;;  %814 = vtanh.f32 %v440_v43  ;;  %v455_v52 = vadd.f32 %v454_v45, %v452_v44  ;;  %v466_v53 = vstv %s1323_s30  ;;  %v469_v57 = vstv %s1329_s9  ;;  %s1423_s30 = sld [smem:[#allocation9 + $0x1b]]  ;;  %s748_s9 = sld [smem:[#allocation9 + $0x1c]] }
  0x7f   :  { %v384_v54 = vmul.f32 %v807_v50, %v383_v35  ;;  %v388_v55 = vmul.f32 %v807_v50, %v387_v36  ;;  %v467_v56 = vmul.f32 %v466_v53, %v1047_v0  ;;  %v417_v59 = vstv %s1325_s6  ;;  %s755_s6 = sld [smem:[#allocation7 + $0x1e]] }
  0x80   :  { %v809_v58 = vpop.eup %808  ;;  %816 = vtanh.f32 %v455_v52  ;;  %v481_v60 = vstv %s1334_s0  ;;  %v484_v61 = vstv %s1336_s1  ;;  %v428_v4 = vstv %s1341_s2  ;;  %s759_s0 = sld [smem:[#allocation7 + $0x1f]]  ;;  %s752_s1 = sld [smem:[#allocation9 + $0x1d]] }
  0x81   :  { %v385_v62 = vadd.f32 %v384_v54, %v370_v46  ;;  %v389_v63 = vadd.f32 %v388_v55, %v374_v47  ;;  %v399_v1 = vmul.f32 %v809_v58, %v398_v48  ;;  %v403_v2 = vmul.f32 %v809_v58, %v402_v49  ;;  %s756_s2 = sld [smem:[#allocation9 + $0x1e]] }
  0x82   :  { %v811_v3 = vpop.eup %810  ;;  %v432_v5 = vstv %s1343_s10  ;;  %v470_v6 = vadd.f32 %v469_v57, %v467_v56  ;;  %v482_v7 = vmul.f32 %v481_v60, %v1047_v0  ;;  %v496_v13 = vstv %s1349_s11  ;;  %s760_s10 = sld [smem:[#allocation9 + $0x1f]] }
  0x83   :  { %v400_v8 = vadd.f32 %v399_v1, %v385_v62  ;;  %v404_v9 = vadd.f32 %v403_v2, %v389_v63  ;;  %v414_v10 = vmul.f32 %v811_v3, %v413_v51  ;;  %v418_v11 = vmul.f32 %v811_v3, %v417_v59 }
  0x84   :  { %818 = vtanh.f32 %v470_v6  ;;  %v485_v12 = vadd.f32 %v484_v61, %v482_v7  ;;  %v499_v14 = vstv %s1351_s12  ;;  %v443_v17 = vstv %s1355_s13 }
  0x85   :  { %v415_v15 = vadd.f32 %v414_v10, %v400_v8  ;;  %v419_v16 = vadd.f32 %v418_v11, %v404_v9  ;;  %v497_v18 = vmul.f32 %v496_v13, %v1047_v0  ;;  %v447_v20 = vstv %s1357_s14  ;;  %s956_s14 = smov [#allocation13]  }
  0x86   :  { %v813_v19 = vpop.eup %812  ;;  %820 = vtanh.f32 %v485_v12  ;;  %v511_v21 = vstv %s1361_s15  ;;  %v514_v22 = vstv %s1363_s16  ;;  %v458_v28 = vstv %s1368_s17  ;;  %s620_s15 = sshll.u32 %s956_s14, 4  ;;  %s1435_s15 = int_to_ptr.vmem [resolvable:$true] %s620_s15 }
  0x87   :  { %v429_v23 = vmul.f32 %v813_v19, %v428_v4  ;;  %v433_v24 = vmul.f32 %v813_v19, %v432_v5  ;;  %v500_v25 = vadd.f32 %v499_v14, %v497_v18  ;;  %v512_v26 = vmul.f32 %v511_v21, %v1047_v0 }
  0x88   :  { %v815_v27 = vpop.eup %814  ;;  %v526_v29 = vstv %s1372_s18  ;;  %v529_v33 = vstv %s1374_s19  ;;  %v462_v40 = vstv %s1379_s20  ;;  %v473_v41 = vstv %s1381_s21 }
  0x89   :  { %v430_v30 = vadd.f32 %v429_v23, %v415_v15  ;;  %v434_v31 = vadd.f32 %v433_v24, %v419_v16  ;;  %v444_v32 = vmul.f32 %v815_v27, %v443_v17  ;;  %v448_v35 = vmul.f32 %v815_v27, %v447_v20 }
  0x8a   :  { %v817_v34 = vpop.eup %816  ;;  %822 = vtanh.f32 %v500_v25  ;;  %v515_v36 = vadd.f32 %v514_v22, %v512_v26  ;;  %v527_v37 = vmul.f32 %v526_v29, %v1047_v0  ;;  %v541_v43 = vstv %s1385_s22 }
  0x8b   :  { %v445_v38 = vadd.f32 %v444_v32, %v430_v30  ;;  %v459_v39 = vmul.f32 %v817_v34, %v458_v28  ;;  %v488_v45 = vstv %s1388_s23  ;;  %v542_v46 = vmul.f32 %v541_v43, %v1047_v0 }
  0x8c   :  { %824 = vtanh.f32 %v515_v36  ;;  %v530_v42 = vadd.f32 %v529_v33, %v527_v37  ;;  %v544_v47 = vstv %s1391_s24  ;;  %v449_v49 = vadd.f32 %v448_v35, %v434_v31 }
  0x8d   :  { %v460_v44 = vadd.f32 %v459_v39, %v445_v38  ;;  %v463_v50 = vmul.f32 %v817_v34, %v462_v40  ;;  %v556_v51 = vstv %s1396_s3  ;;  %v477_v53 = vstv %s1398_s4  ;;  %v84_v39 = vld [vmem:[%s1471_s5] sm:$0xff]  ;;  %s955_s5 = smov [#allocation12]  }
  0x8e   :  { %v819_v48 = vpop.eup %818  ;;  %826 = vtanh.f32 %v530_v42  ;;  %v545_v54 = vadd.f32 %v544_v47, %v542_v46  ;;  %v557_v55 = vmul.f32 %v556_v51, %v1047_v0  ;;  %v559_v57 = vstv %s1403_s25  ;;  %s610_s13 = sshll.u32 %s955_s5, 4  ;;  %s611_s13 = int_to_ptr.vmem [resolvable:$true] %s610_s13 }
  0x8f   :  { %v474_v52 = vmul.f32 %v819_v48, %v473_v41  ;;  %v503_v60 = vstv %s1405_s26  ;;  %v464_v61 = vadd.f32 %v463_v50, %v449_v49  ;;  %v478_v62 = vmul.f32 %v819_v48, %v477_v53  ;;  %s894_s16 = scalar_lea.vmem %s611_s13, 128  ;;  %p899_p6 = scmp.lt.s32.totalorder %s611_s13, %s611_s13 }
  0x90   :  { %v821_v56 = vpop.eup %820  ;;  %828 = vtanh.f32 %v545_v54  ;;  %v560_v63 = vadd.f32 %v559_v57, %v557_v55  ;;  %v492_v2 = vstv %s1410_s27  ;;  %v518_v4 = vstv %s1413_s28  ;;  %p895_p5 = scmp.ne.s32.totalorder %s611_s13, %s894_s16  ;;  %p900_p7 = scmp.lt.s32.totalorder %s894_s16, %s894_s16 }
  0x91   :  { %v475_v58 = vadd.f32 %v474_v52, %v460_v44  ;;  %v489_v59 = vmul.f32 %v821_v56, %v488_v45  ;;  %v479_v6 = vadd.f32 %v478_v62, %v464_v61  ;;  %v493_v7 = vmul.f32 %v821_v56, %v492_v2 }
  0x92   :  { %830 = vtanh.f32 %v560_v63  ;;  %v533_v8 = vstv %s1419_s29  ;;  %v507_v10 = vstv %s1423_s30  ;;  %v548_v17 = vstv %s755_s6  ;;  %p901_p8 = por %p900_p7, %p899_p6 }
  0x93   :  { %v490_v1 = vadd.f32 %v489_v59, %v475_v58  ;;  %v494_v15 = vadd.f32 %v493_v7, %v479_v6  ;;  %v522_v18 = vstv %s748_s9  ;;  %v563_v21 = vstv %s759_s0 }
  0x94   :  { %v823_v3 = vpop.eup %822  ;;  %v537_v26 = vstv %s752_s1  ;;  %v552_v32 = vstv %s756_s2  ;;  %v567_v36 = vstv %s760_s10  ;;  %p902_p9 = pnand %p901_p8, %p895_p5 }
  0x95   :  { %v504_v0 = vmul.f32 %v823_v3, %v503_v60  ;;  %v508_v16 = vmul.f32 %v823_v3, %v507_v10 }
  0x96   :  { %v825_v5 = vpop.eup %824 }
  0x97   :  { %v505_v9 = vadd.f32 %v504_v0, %v490_v1  ;;  %v519_v11 = vmul.f32 %v825_v5, %v518_v4  ;;  %v509_v24 = vadd.f32 %v508_v16, %v494_v15  ;;  %v523_v25 = vmul.f32 %v825_v5, %v522_v18 }
  0x98   :  { %v827_v12 = vpop.eup %826 }
  0x99   :  { %v520_v13 = vadd.f32 %v519_v11, %v505_v9  ;;  %v534_v14 = vmul.f32 %v827_v12, %v533_v8  ;;  %v524_v30 = vadd.f32 %v523_v25, %v509_v24  ;;  %v538_v31 = vmul.f32 %v827_v12, %v537_v26 }
  0x9a   :  { %v829_v20 = vpop.eup %828 }
  0x9b   :  { %v535_v19 = vadd.f32 %v534_v14, %v520_v13  ;;  %v549_v22 = vmul.f32 %v829_v20, %v548_v17  ;;  %v539_v34 = vadd.f32 %v538_v31, %v524_v30  ;;  %v553_v35 = vmul.f32 %v829_v20, %v552_v32 }
  0x9c   :  { %v831_v23 = vpop.eup %830 }
  0x9d   :  { %v550_v27 = vadd.f32 %v549_v22, %v535_v19  ;;  %v564_v28 = vmul.f32 %v831_v23, %v563_v21  ;;  %v554_v37 = vadd.f32 %v553_v35, %v539_v34  ;;  %v568_v38 = vmul.f32 %v831_v23, %v567_v36 }
  0x9f   :  { %v565_v29 = vadd.f32 %v564_v28, %v550_v27  ;;  %v569_v40 = vadd.f32 %v568_v38, %v554_v37 }
  0xa1   :  { %v570_v33 = vmul.f32 1.442695, %v565_v29 }
  0xa3   :  { %832 = vpow2.f32 %v570_v33 }
  0xad   :  { %v833_v41 = vpop.eup %832 }
  0xae   :  { %v572_v42 = vmul.f32 %v833_v41, %v84_v39 }
  0xb0   :  { %v573_v43 = vadd.f32 %v572_v42, %v569_v40 }
  0xb2   :  { %v577_v44 = vand.u32 2147483647, %v573_v43  ;;  %v574_v54 = vmax.f32 %v573_v43, 0.0  ;;  %vm575_vm1 = vcmp.ne.f32.partialorder %v573_v43, %v573_v43  ;;  %v595_v61 = vadd.f32 %v573_v43, %v565_v29 }
  0xb4   :  { %v578_v45 = vsub.f32 0.0, %v577_v44 }
  0xb6   :  { %v579_v46 = vmul.f32 1.442695, %v578_v45 }
  0xb8   :  { %834 = vpow2.f32 %v579_v46 }
  0xc2   :  { %v835_v47 = vpop.eup %834 }
  0xc3   :  { %v581_v48 = vadd.f32 1.0, %v835_v47  ;;  %v584_v49 = vmul.f32 -0.5, %v835_v47  ;;  %v587_v51 = vand.u32 2147483647, %v835_v47 }
  0xc5   :  { %836 = vlog2.f32 %v581_v48  ;;  %v585_v50 = vadd.f32 1.0, %v584_v49  ;;  %vm588_vm0 = vcmp.lt.f32.partialorder %v587_v51, 0.0004427343 }
  0xc7   :  { %v586_v52 = vmul.f32 %v835_v47, %v585_v50 }
  0xcf   :  { %v837_v53 = vpop.eup %836 }
  0xd0   :  { %v583_v55 = vmul.f32 0.6931472, %v837_v53 }
  0xd2   :  { %v589_v56 = vsel %vm588_vm0, %v586_v52, %v583_v55 }
  0xd3   :  { %v590_v57 = vadd.f32 %v589_v56, %v574_v54 }
  0xd5   :  { %v591_v58 = vsel %vm575_vm1, %v573_v43, %v590_v57 }
  0xd6   :  { %v592_v59 = vsub.f32 %v573_v43, %v591_v58  ;;  %v596_v62 = vmul.f32 2.0, %v591_v58 }
  0xd8   :  { %v593_v60 = vmul.f32 1.442695, %v592_v59  ;;  %v597_v63 = vsub.f32 %v595_v61, %v596_v62 }
  0xda   :  { %838 = vpow2.f32 %v593_v60 }
  0xe4   :  { %v839_v1 = vpop.eup %838 }
  0xe5   :  { %vm598_vm2 = vcmp.ge.f32.partialorder %v839_v1, 0.0  ;;  %vm599_vm3 = vcmp.le.f32.partialorder %v839_v1, 1.0  ;;  %602 = vst [vmem:[#allocation12] sm:$0xff] %v839_v1 }
  0xe6   :  { %vm600_vm4 = vmand %vm598_vm2, %vm599_vm3 }
  0xe7   :  { %905 = shalt.err (!%p902_p9)
}
  0xe8   :  { %s906_s19 = scalar_lea.hbm %s1473_s7, 128 }
  0xe9   :  { %p907_p10 = scmp.ne.s32.totalorder %s1473_s7, %s906_s19  ;;  %p910_p11 = scmp.lt.u32.totalorder %s906_s19, %s1473_s7 }
  0xeb   :  { %p912_p12 = pnand %p910_p11, %p907_p10 }
  0xed   :  { %915 = shalt.err (!%p912_p12)
}
  0xee   :  { %613 = dma.vmem_to_hbm [thread:$0]  %s611_s13, 128, %s1473_s7, [#allocation3]   ;;  %v601_v2 = vsel %vm600_vm4, %v597_v63, -inf }
  0xef   :  { %603 = vst [vmem:[#allocation13] sm:$0xff] %v601_v2  ;;  %s916_s4 = scalar_lea.vmem %s1435_s15, 128  ;;  %p921_p0 = scmp.lt.s32.totalorder %s1435_s15, %s1435_s15 }
  0xf0   :  { %p917_p13 = scmp.ne.s32.totalorder %s1435_s15, %s916_s4  ;;  %p922_p1 = scmp.lt.s32.totalorder %s916_s4, %s916_s4 }
  0xf2   :  { %p923_p2 = por %p922_p1, %p921_p0 }
  0xf4   :  { %p924_p3 = pnand %p923_p2, %p917_p13 }
  0xf6   :  { %927 = shalt.err (!%p924_p3)
}
  0xf7   :  { %s928_s27 = scalar_lea.hbm %s1474_s8, 128 }
  0xf8   :  { %p929_p4 = scmp.ne.s32.totalorder %s1474_s8, %s928_s27  ;;  %p932_p5 = scmp.lt.u32.totalorder %s928_s27, %s1474_s8 }
  0xfa   :  { %p934_p6 = pnand %p932_p5, %p929_p4 }
  0xfc   :  { %937 = shalt.err (!%p934_p6)
}
  0xfd   :  { %623 = dma.vmem_to_hbm [thread:$0]  %s1435_s15, 128, %s1474_s8, [#allocation14]  }
  0xfe   :  { %946 = dma.done.wait [#allocation3], 128  }
  0xff   :  { %947 = vsyncadd [#allocation3], 4294967168 }
 0x100   :  { %948 = dma.done.wait [#allocation14], 128  }
 0x101   :  { %949 = vsyncadd [#allocation14], 4294967168 }
 0x102   :  { %630 = vsyncpa [#allocation3], 1 }
 0x103   :  { %631 = vsyncpa [#allocation14], 1 }
 0x104   :  { %632 = vsyncpa [#allocation4], 1 }
 0x105   :  { %633 = vsyncpa [#allocation10], 1 }
 0x106   :  { %634 = vsyncpa [#allocation5], 1 }
 0x107   :  { %635 = vsyncpa [#allocation8], 1 }

</bundles_post_ra>
